<compile_context>
chip_gen: v5e
topology: v5e:2x2
jax: 0.10.0
libtpu: 0.0.40
codegen_flags: <defaults>
</compile_context>

<pallas_src>
import jax
import jax.numpy as jnp
from jax.experimental import pallas as pl
from jax.experimental.pallas import tpu as pltpu


# ----------------------------- Pallas kernel ------------------------------ #
def _fairrec_kernel(x0_ref, x1_ref, x2_ref, x4_ref, small_ref, ce_wt_ref, out_ref):
    TB, S, D = x0_ref.shape
    G = x2_ref.shape[1]

    # Packed small params (f32): rows = [attn_w, attn_b, fav_b, ce_b, fav_wt...],
    # padded to W = max(D, S) lanes.
    small = small_ref[...]
    attn_w = small[0:1, 0:D]               # (1, D)
    attn_b = small[1:2, 0:S]               # (1, S)
    fav_b = small[2:3, 0:D]                # (1, D)
    ce_b = small[3:4, 0:D]                 # (1, D)
    fav_wt = small[4:4 + G, 0:D]           # (G, D)

    # Fused items = x[0] + x[1]; bf16 HBM operands are upcast to f32 for the
    # elementwise / transcendental work (v5e has no bf16 VALU/EUP).
    items = x0_ref[...].astype(jnp.float32) + x1_ref[...].astype(jnp.float32)

    # ------------- Attention(feature_dim=D, step_dim=S) -------------------
    eij = jnp.sum(items * attn_w.reshape(1, 1, D), axis=-1)      # (TB, S) lane reduce
    eij = jnp.tanh(eij + attn_b)                                  # (1, S) broadcast
    a = jnp.exp(eij)                                              # safe: tanh bounds eij
    # Exact divide (correctness fix: approx reciprocal had ~1e-3 rel error).
    a = a / (jnp.sum(a, axis=1, keepdims=True) + 1e-10)
    ups = jnp.sum(items * a[:, :, None], axis=1)                  # (TB, D) sublane reduce

    # ------------- fs = relu(fav(x[2])), K = G (tiny) ----------------------
    # Exact f32 vectorized broadcast-multiply-reduce. G is tiny and the kernel is
    # HBM-bound, so this costs nothing; it also keeps the path bit-exact in f32
    # (the block-diagonal [fav|ce] MXU fusion would force x2/fav_wt to bf16 or an
    # extra HBM-materialized augmented input, which is not worth it at K=4).
    x2f = x2_ref[...].astype(jnp.float32)                         # (TB, G)
    fs = jnp.sum(x2f[:, :, None] * fav_wt[None, :, :], axis=1) + fav_b
    fs = jnp.maximum(fs, 0.0)                                     # (TB, D)

    # ------------- cs = relu(ce(x[4])): bf16-native MXU matmul -------------
    cs = jnp.dot(x4_ref[...], ce_wt_ref[...],
                 preferred_element_type=jnp.float32) + ce_b
    cs = jnp.maximum(cs, 0.0)                                     # (TB, D)

    # Lane-dense output: assemble the whole (TB, 3D) row and issue one store
    # (single full-tile store instead of three masked lane-offset slice stores).
    out_ref[...] = jnp.concatenate([ups, fs, cs], axis=1).astype(out_ref.dtype)


# ------------------------------- wrapper ----------------------------------- #
def pack_params(params):
    """Pack the small per-feature parameters (attn_w, attn_b, fav_b, ce_b, fav_wt)
    into one f32 (4+G, max(D, S)) block (done once). ce_wt stays separate (big)."""
    attn_w = jnp.asarray(params["attn_w"], jnp.float32).reshape(1, -1)
    attn_b = jnp.asarray(params["attn_b"], jnp.float32).reshape(1, -1)
    fav_b = jnp.asarray(params["fav_b"], jnp.float32).reshape(1, -1)
    ce_b = jnp.asarray(params["ce_b"], jnp.float32).reshape(1, -1)
    fav_wt = jnp.asarray(params["fav_wt"], jnp.float32)
    D, S = fav_wt.shape[1], attn_b.shape[1]
    W = max(D, S)
    pad = lambda a: jnp.pad(a, ((0, 0), (0, W - a.shape[1])))
    small = jnp.concatenate(
        [pad(attn_w), pad(attn_b), pad(fav_b), pad(ce_b), pad(fav_wt)], axis=0)
    return dict(small=small, ce_wt=params["ce_wt"])


def fairrec_state_repr(x, packed, *, tb=256):
    """x: [x0, x1, x2, x3 (unused), x4]; packed: output of pack_params()."""
    x0, x1, x2, _, x4 = x
    B, S, D = x0.shape          # explicit (B, S, D) contract — no axis-less squeeze
    G = x2.shape[1]
    ce_in = x4.shape[1]
    small, ce_wt = packed["small"], packed["ce_wt"]

    tb = min(tb, B)
    if tb % 16 != 0:            # keep bf16 sublane packing aligned; fall back to
        tb = B                  # a full-batch block (block dim == array dim is legal)
    grid = (pl.cdiv(B, tb),)

    return pl.pallas_call(
        _fairrec_kernel,
        out_shape=jax.ShapeDtypeStruct((B, 3 * D), jnp.float32),
        grid=grid,
        in_specs=[
            pl.BlockSpec((tb, S, D), lambda i: (i, 0, 0)),      # x0 (batch-tiled)
            pl.BlockSpec((tb, S, D), lambda i: (i, 0, 0)),      # x1 (batch-tiled)
            pl.BlockSpec((tb, G), lambda i: (i, 0)),            # x2 (batch-tiled)
            pl.BlockSpec((tb, ce_in), lambda i: (i, 0)),        # x4 (batch-tiled)
            pl.BlockSpec(small.shape, lambda i: (0, 0)),        # packed params (pinned)
            pl.BlockSpec(ce_wt.shape, lambda i: (0, 0)),        # ce weight (pinned)
        ],
        out_specs=pl.BlockSpec((tb, 3 * D), lambda i: (i, 0)),
        compiler_params=pltpu.CompilerParams(
            # Megacore / v7x dual-TC sharding over the batch grid axis.
            dimension_semantics=("parallel",),
            # >= the v5e scoped default, == the v6e/v7x default. For production
            # TB (256-1024 rows) raise this on v5e/v6e; re-derive TB against
            # v7x's 64 MiB physical VMEM (roughly half the v6e-sized tile).
            vmem_limit_bytes=32 * 1024 * 1024,
        ),
    )(x0, x1, x2, x4, small, ce_wt)


# ----------------------------- pure-JAX reference -------------------------- #
def fairrec_reference(x, params):
    f32 = lambda a: jnp.asarray(a, jnp.float32)
    x0, x1, x2, _, x4 = x
    items = f32(x0) + f32(x1)
    attn_w = f32(params["attn_w"])[0]            # (D,)
    attn_b = f32(params["attn_b"])[0]            # (S,)
    eij = jnp.tanh(jnp.sum(items * attn_w[None, None, :], axis=-1) + attn_b[None, :])
    a = jnp.exp(eij)
    a = a / (jnp.sum(a, axis=1, keepdims=True) + 1e-10)
    ups = jnp.sum(items * a[:, :, None], axis=1)
    fs = jnp.maximum(
        jnp.dot(f32(x2), f32(params["fav_wt"]),
                precision=jax.lax.Precision.HIGHEST) + f32(params["fav_b"]), 0.0)
    cs = jnp.maximum(
        jnp.dot(f32(x4), f32(params["ce_wt"]),
                precision=jax.lax.Precision.HIGHEST) + f32(params["ce_b"]), 0.0)
    return jnp.concatenate([ups, fs, cs], axis=1)


# ----------------------------- parameter init ------------------------------ #
def init_params(key, embedding_dim, state_size, n_groups, ce_in=512):
    k_attn, k_fav, k_ce = jax.random.split(key, 3)
    # Attention.weight: kaiming_uniform_ on (D, 1) => fan_in = 1, bound = sqrt(6).
    bound = jnp.sqrt(6.0)
    attn_w = jax.random.uniform(k_attn, (1, embedding_dim),
                                minval=-bound, maxval=bound, dtype=jnp.float32)
    attn_b = jnp.zeros((1, state_size), jnp.float32)
    # fav: nn.Linear(n_groups, D), weight ~ U(0,1), bias = 0. Stored as (G, D).
    fav_wt = jax.random.uniform(k_fav, (n_groups, embedding_dim), dtype=jnp.float32)
    fav_b = jnp.zeros((1, embedding_dim), jnp.float32)
    # ce: nn.Linear(512, D), weight ~ U(0,1), bias = 0. Stored as (512, D).
    ce_wt = jax.random.uniform(k_ce, (ce_in, embedding_dim), dtype=jnp.float32)
    ce_b = jnp.zeros((1, embedding_dim), jnp.float32)
    return dict(attn_w=attn_w, attn_b=attn_b,
                fav_wt=fav_wt, fav_b=fav_b,
                ce_wt=ce_wt, ce_b=ce_b)


# ----------------------------------- main ---------------------------------- #
if __name__ == "__main__":
    B = 32           # batch
    S = 8            # state_size (attention step_dim)
    D = 32           # embedding_dim (attention feature_dim)
    G = 4            # n_groups
    CE_IN = 512      # hard-coded in the module: nn.Linear(512, embedding_dim)
    TB = 16          # batch tile -> grid of 2, exercises the pipelined B grid

    key = jax.random.PRNGKey(0)
    kp, k0, k1, k2, k3, k4 = jax.random.split(key, 6)

    params = init_params(kp, D, S, G, CE_IN)
    # Bandwidth optimization: keep the big HBM operand (ce weight) in bf16; the
    # reference consumes the SAME bf16 values (upcast), so both paths see
    # identical data.
    params["ce_wt"] = params["ce_wt"].astype(jnp.bfloat16)
    packed = pack_params(params)   # packed once, outside the hot path

    x = [
        jax.random.normal(k0, (B, S, D), jnp.float32).astype(jnp.bfloat16),   # x[0]
        jax.random.normal(k1, (B, S, D), jnp.float32).astype(jnp.bfloat16),   # x[1]
        jax.random.normal(k2, (B, G), jnp.float32),                            # x[2]
        jax.random.normal(k3, (B, 1), jnp.float32),                            # x[3] (unused)
        jax.random.normal(k4, (B, CE_IN), jnp.float32).astype(jnp.bfloat16),  # x[4]
    ]

    out = jax.block_until_ready(fairrec_state_repr(x, packed, tb=TB))
    ref = jax.block_until_ready(fairrec_reference(x, params))

    assert out.shape == (B, 3 * D), out.shape
    # Both paths consume the same (bf16-sourced) data and compute in f32; the
    # remaining differences are f32 accumulation-order level (~1e-5).
    err = float(jnp.max(jnp.abs(out - ref)))
    assert jnp.allclose(out, ref, atol=1e-3, rtol=1e-3), err
    print("KERNEL_OK")
</pallas_src>

<mosaic_0001>
module attributes {stable_mosaic.version = 11 : i64} {
  func.func @_fairrec_kernel(%arg0: i32, %arg1: memref<16x8x32xbf16, #tpu.memory_space<vmem>>, %arg2: memref<16x8x32xbf16, #tpu.memory_space<vmem>>, %arg3: memref<16x4xf32, #tpu.memory_space<vmem>>, %arg4: memref<16x512xbf16, #tpu.memory_space<vmem>>, %arg5: memref<8x32xf32, #tpu.memory_space<vmem>>, %arg6: memref<512x32xbf16, #tpu.memory_space<vmem>>, %arg7: memref<16x96xf32, #tpu.memory_space<vmem>>) attributes {dimension_semantics = [#tpu.dimension_semantics<parallel>], iteration_bounds = array<i64: 2>, scalar_prefetch = 0 : i64, scratch_operands = 0 : i64, tpu.core_type = #tpu.core_type<tc>, window_params = [{transform_indices = @transform_0, window_bounds = array<i64: 16, 8, 32>}, {transform_indices = @transform_1, window_bounds = array<i64: 16, 8, 32>}, {transform_indices = @transform_2, window_bounds = array<i64: 16, 4>}, {transform_indices = @transform_3, window_bounds = array<i64: 16, 512>}, {pipeline_mode = #tpu.pipeline_mode<synchronous>, transform_indices = @transform_4, window_bounds = array<i64: 8, 32>}, {pipeline_mode = #tpu.pipeline_mode<synchronous>, transform_indices = @transform_5, window_bounds = array<i64: 512, 32>}, {transform_indices = @transform_6, window_bounds = array<i64: 16, 96>}]} {
    %c0 = arith.constant 0 : index
    %c0_0 = arith.constant 0 : index
    %0 = vector.load %arg5[%c0, %c0_0] : memref<8x32xf32, #tpu.memory_space<vmem>>, vector<8x32xf32>
    %1 = vector.extract_strided_slice %0 {offsets = [0, 0], sizes = [1, 32], strides = [1, 1]} : vector<8x32xf32> to vector<1x32xf32>
    %2 = vector.extract_strided_slice %0 {offsets = [1, 0], sizes = [1, 8], strides = [1, 1]} : vector<8x32xf32> to vector<1x8xf32>
    %3 = vector.extract_strided_slice %0 {offsets = [2, 0], sizes = [1, 32], strides = [1, 1]} : vector<8x32xf32> to vector<1x32xf32>
    %4 = vector.extract_strided_slice %0 {offsets = [3, 0], sizes = [1, 32], strides = [1, 1]} : vector<8x32xf32> to vector<1x32xf32>
    %5 = vector.extract_strided_slice %0 {offsets = [4, 0], sizes = [4, 32], strides = [1, 1]} : vector<8x32xf32> to vector<4x32xf32>
    %c0_1 = arith.constant 0 : index
    %c0_2 = arith.constant 0 : index
    %c0_3 = arith.constant 0 : index
    %6 = vector.load %arg1[%c0_1, %c0_2, %c0_3] : memref<16x8x32xbf16, #tpu.memory_space<vmem>>, vector<16x8x32xbf16>
    %7 = arith.extf %6 : vector<16x8x32xbf16> to vector<16x8x32xf32>
    %c0_4 = arith.constant 0 : index
    %c0_5 = arith.constant 0 : index
    %c0_6 = arith.constant 0 : index
    %8 = vector.load %arg2[%c0_4, %c0_5, %c0_6] : memref<16x8x32xbf16, #tpu.memory_space<vmem>>, vector<16x8x32xbf16>
    %9 = arith.extf %8 : vector<16x8x32xbf16> to vector<16x8x32xf32>
    %10 = arith.addf %7, %9 : vector<16x8x32xf32>
    %11 = vector.shape_cast %1 : vector<1x32xf32> to vector<1x1x32xf32>
    %12 = vector.broadcast %11 : vector<1x1x32xf32> to vector<16x8x32xf32>
    %13 = arith.mulf %10, %12 : vector<16x8x32xf32>
    %cst = arith.constant dense<0.000000e+00> : vector<16x8xf32>
    %14 = vector.multi_reduction <add>, %13, %cst [2] : vector<16x8x32xf32> to vector<16x8xf32>
    %15 = vector.broadcast %2 : vector<1x8xf32> to vector<16x8xf32>
    %16 = arith.addf %14, %15 : vector<16x8xf32>
    %17 = math.tanh %16 : vector<16x8xf32>
    %18 = math.exp %17 : vector<16x8xf32>
    %cst_7 = arith.constant dense<0.000000e+00> : vector<16xf32>
    %19 = vector.multi_reduction <add>, %18, %cst_7 [1] : vector<16x8xf32> to vector<16xf32>
    %20 = vector.shape_cast %19 : vector<16xf32> to vector<16x1xf32>
    %cst_8 = arith.constant 1.000000e-10 : f32
    %21 = vector.broadcast %cst_8 : f32 to vector<16x1xf32>
    %22 = arith.addf %20, %21 : vector<16x1xf32>
    %23 = vector.broadcast %22 : vector<16x1xf32> to vector<16x8xf32>
    %24 = arith.divf %18, %23 : vector<16x8xf32>
    %25 = vector.shape_cast %24 : vector<16x8xf32> to vector<16x8x1xf32>
    %26 = vector.broadcast %25 : vector<16x8x1xf32> to vector<16x8x32xf32>
    %27 = arith.mulf %10, %26 : vector<16x8x32xf32>
    %cst_9 = arith.constant dense<0.000000e+00> : vector<16x32xf32>
    %28 = vector.multi_reduction <add>, %27, %cst_9 [1] : vector<16x8x32xf32> to vector<16x32xf32>
    %c0_10 = arith.constant 0 : index
    %c0_11 = arith.constant 0 : index
    %29 = vector.load %arg3[%c0_10, %c0_11] : memref<16x4xf32, #tpu.memory_space<vmem>>, vector<16x4xf32>
    %30 = vector.shape_cast %29 : vector<16x4xf32> to vector<16x4x1xf32>
    %31 = vector.shape_cast %5 : vector<4x32xf32> to vector<1x4x32xf32>
    %32 = vector.broadcast %30 : vector<16x4x1xf32> to vector<16x4x32xf32>
    %33 = vector.broadcast %31 : vector<1x4x32xf32> to vector<16x4x32xf32>
    %34 = arith.mulf %32, %33 : vector<16x4x32xf32>
    %cst_12 = arith.constant dense<0.000000e+00> : vector<16x32xf32>
    %35 = vector.multi_reduction <add>, %34, %cst_12 [1] : vector<16x4x32xf32> to vector<16x32xf32>
    %36 = vector.broadcast %3 : vector<1x32xf32> to vector<16x32xf32>
    %37 = arith.addf %35, %36 : vector<16x32xf32>
    %cst_13 = arith.constant 0.000000e+00 : f32
    %38 = vector.broadcast %cst_13 : f32 to vector<16x32xf32>
    %39 = arith.maximumf %37, %38 : vector<16x32xf32>
    %c0_14 = arith.constant 0 : index
    %c0_15 = arith.constant 0 : index
    %40 = vector.load %arg4[%c0_14, %c0_15] : memref<16x512xbf16, #tpu.memory_space<vmem>>, vector<16x512xbf16>
    %c0_16 = arith.constant 0 : index
    %c0_17 = arith.constant 0 : index
    %41 = vector.load %arg6[%c0_16, %c0_17] : memref<512x32xbf16, #tpu.memory_space<vmem>>, vector<512x32xbf16>
    %cst_18 = arith.constant dense<0.000000e+00> : vector<16x32xf32>
    %42 = tpu.matmul %40, %41, %cst_18 {dimension_numbers = #tpu.dot_dimension_numbers<[1], [0], [0], [1], [0, 0, 1, 1], [], []>} : vector<16x512xbf16>, vector<512x32xbf16>, vector<16x32xf32> -> vector<16x32xf32>
    %43 = vector.broadcast %4 : vector<1x32xf32> to vector<16x32xf32>
    %44 = arith.addf %42, %43 : vector<16x32xf32>
    %cst_19 = arith.constant 0.000000e+00 : f32
    %45 = vector.broadcast %cst_19 : f32 to vector<16x32xf32>
    %46 = arith.maximumf %44, %45 : vector<16x32xf32>
    %47 = tpu.concatenate %28, %39, %46 in 1 : vector<16x32xf32>, vector<16x32xf32>, vector<16x32xf32> -> vector<16x96xf32>
    %c0_20 = arith.constant 0 : index
    %c0_21 = arith.constant 0 : index
    %48 = vector.load %arg7[%c0_20, %c0_21] : memref<16x96xf32, #tpu.memory_space<vmem>>, vector<16x96xf32>
    tpu.vector_store %arg7[%c0_20, %c0_21], %47 {strides = array<i32>} : memref<16x96xf32, #tpu.memory_space<vmem>>, vector<16x96xf32>,
    return
  }
  func.func @transform_0(%arg0: i32) -> (i32, i32, i32) {
    %c0_i32 = arith.constant 0 : i32
    %c0_i32_0 = arith.constant 0 : i32
    %c0_i32_1 = arith.constant 0 : i32
    return %arg0, %c0_i32, %c0_i32_0 : i32, i32, i32
  }
  func.func @transform_1(%arg0: i32) -> (i32, i32, i32) {
    %c0_i32 = arith.constant 0 : i32
    %c0_i32_0 = arith.constant 0 : i32
    %c0_i32_1 = arith.constant 0 : i32
    return %arg0, %c0_i32, %c0_i32_0 : i32, i32, i32
  }
  func.func @transform_2(%arg0: i32) -> (i32, i32) {
    %c0_i32 = arith.constant 0 : i32
    %c0_i32_0 = arith.constant 0 : i32
    return %arg0, %c0_i32 : i32, i32
  }
  func.func @transform_3(%arg0: i32) -> (i32, i32) {
    %c0_i32 = arith.constant 0 : i32
    %c0_i32_0 = arith.constant 0 : i32
    return %arg0, %c0_i32 : i32, i32
  }
  func.func @transform_4(%arg0: i32) -> (i32, i32) {
    %c0_i32 = arith.constant 0 : i32
    %c0_i32_0 = arith.constant 0 : i32
    %c0_i32_1 = arith.constant 0 : i32
    return %c0_i32, %c0_i32_0 : i32, i32
  }
  func.func @transform_5(%arg0: i32) -> (i32, i32) {
    %c0_i32 = arith.constant 0 : i32
    %c0_i32_0 = arith.constant 0 : i32
    %c0_i32_1 = arith.constant 0 : i32
    return %c0_i32, %c0_i32_0 : i32, i32
  }
  func.func @transform_6(%arg0: i32) -> (i32, i32) {
    %c0_i32 = arith.constant 0 : i32
    %c0_i32_0 = arith.constant 0 : i32
    return %arg0, %c0_i32 : i32, i32
  }
}

</mosaic_0001>

<bundles_post_ra>
// kernel: tpu_custom_call.1
= control target key start
LH: loop header
LB: loop body
LE: loop exit
PB: predicated region body
PF: predicated region fallthrough
CT: control target
= control target key end

     0   :  { %11 = vsyncpa [#allocation3], 0  ;;  %s3406_s0 = inlined_call_operand.vmem [shape: bf16[32,8,32], index: 0, kind: input, shape index: {}]   ;;  %s3407_s1 = inlined_call_operand.vmem [shape: bf16[32,8,32], index: 1, kind: input, shape index: {}]   ;;  %s3408_s2 = inlined_call_operand.vmem [shape: f32[32,4], index: 2, kind: input, shape index: {}]   ;;  %s3409_s3 = inlined_call_operand.vmem [shape: bf16[32,512], index: 3, kind: input, shape index: {}]   ;;  %s3410_s4 = inlined_call_operand.vmem [shape: f32[8,32], index: 4, kind: input, shape index: {}]   ;;  %s3411_s5 = inlined_call_operand.vmem [shape: bf16[512,32], index: 5, kind: input, shape index: {}]   ;;  %s3412_s6 = inlined_call_operand.hbm [shape: f32[32,96], index: 6, kind: output, shape index: {}]  }
   0x1   :  { %13 = vsyncpa [#allocation3 + $0x1], 0  ;;  %s2503_s21 = smov 0   ;;  %s2505_s22 = smov 0  }
   0x2   :  { %s2507_s23 = smov 0   ;;  %s2509_s24 = smov 0  }
   0x3 LB: > { %s2524_s25 = sadd.s32 4294967295, %s2461_s24   ;;  %s1968_s26 = sadd.s32 4294967294, %s2461_s24   ;;  %s2461_s24 = sphi %s2509_s24, %s3510_s24   ;;  %s2457_s23 = sphi %s2507_s23, %s3509_s23   ;;  %s2453_s22 = sphi %s2505_s22, %s3508_s22   ;;  %s2449_s21 = sphi %s2503_s21, %s3507_s21  }
   0x4   : > { %s2528_s27 = sadd.s32 1, %s2461_s24   ;;  %s172_s28 = sadd.s32 1, %s2457_s23 }
   0x5   : > { %s169_s29 = ssub.s32 %s2461_s24, %s2528_s27  ;;  %p182_p0 = scmp.ne.s32.totalorder %s2457_s23, %s2453_s22 }
   0x6   : > { %p170_p1 = scmp.eq.s32.totalorder %s169_s29, 0  ;;  %p183_p2 = scmp.eq.s32.totalorder %s2524_s25, 1 }
   0x7   : > { %p188_p3 = scmp.ne.s32.totalorder %s2453_s22, %s2449_s21  ;;  %p189_p4 = scmp.eq.s32.totalorder %s1968_s26, 1 }
   0x8   : > { %s2539_s30 = scalar_select %p170_p1, %s2457_s23, %s172_s28  }
   0x9   : > { %p2541_p5 = por %p183_p2, %p182_p0  ;;  %p2545_p6 = por %p189_p4, %p188_p3 }
   0xa   : > { %p1971_p7 = scmp.ge.s32.totalorder %s2461_s24, 1  ;;  %p250_p8 = scmp.lt.s32.totalorder %s2461_s24, 3 }
   0xc   : > { %p251_p9 = pnand %p1971_p7, %p250_p8 }
   0xe   : > { %254 = sbr.rel (%p251_p9) target bundleno = 823 (0x337), region = 44 }
  0x13   : > { %s2552_s9 = sshll.u32 %s2524_s25, 4  ;;  %v2559_v0 = vld [vmem:[%s3410_s4] sm:$0xff]  ;;  %vm420_vm0 = vcmask 261120   ;;  %v471_v59 = vlaneseq  ;;  %s1977_s20 = sshll.u32 %s2524_s25, 1  ;;  %vm3427_vm1 = vcmask 257024   ;;  %vm3430_vm2 = vcmask 1041409  }
  0x14   : > { %p297_p10 = scmp.lt.s32.totalorder %s2552_s9, 31  ;;  %v2574_v3 = vperm.slane %v2559_v0, 0  ;;  %p309_p11 = scmp.lt.s32.totalorder %s1977_s20, 3  ;;  %vm3429_vm3 = vcmask 1042434   ;;  %vm3428_vm4 = vcmask 1043459   ;;  %vm3426_vm5 = vcmask 1044484  }
  0x15   : > { %v2628_v61 = vshrl.u32 %v471_v59, 7  ;;  %vm3419_vm6 = vcmask 1045509   ;;  %vm3416_vm7 = vcmask 1047559   ;;  %vm3417_vm8 = vcmask 1046534   ;;  %s2419_s12 = scalar_lea.hbm %s3412_s6, 32 }
  0x16   : > { %s298_s10 = scalar_select %p297_p10, %s2552_s9, 31  ;;  %vm647_vm9 = vcmask 64512  }
  0x17   : > { %2291 = vset.pattern.permute.xlu1 %v2628_v61  ;;  %2292 = vset.pattern.permute.xlu0 %v2628_v61  ;;  %s3512_s20 = smov (!%p309_p11, %s1977_s20), 3 }
  0x18   : > { %s1974_s13 = sshll.u32 %s298_s10, 2  ;;  %2293 = vset.pattern.permute.xlu2 %v2628_v61  ;;  %s1978_s26 = sshll.u32 %s3512_s20, 3 }
  0x19   : > { %s2564_s16 = scalar_lea.vmem %s3406_s0, %s1974_s13  ;;  %s2569_s19 = scalar_lea.vmem %s3407_s1, %s1974_s13 }
  0x1a   : > { %v2233_v1 = vld [vmem:[%s2564_s16 + $0x8] sm:$0xff]   ;;  %v2170_v4 = vld [vmem:[%s2564_s16] sm:$0xff]   ;;  %v2234_v14 = vld [vmem:[%s2564_s16 + $0x10] sm:$0xff]   ;;  %s2683_s10 = scalar_lea.vmem %s3408_s2, %s1978_s26  ;;  %s2131_s28 = sshll.u32 %s3512_s20, 4 }
  0x1b   : > { %v2240_v2 = vld [vmem:[%s2569_s19 + $0x8] sm:$0xff]   ;;  %v2175_v5 = vunpack.c.l.bf16 %v2233_v1  ;;  %v2171_v7 = vunpack.c.l.bf16 %v2170_v4  ;;  %v2202_v8 = vld [vmem:[%s2569_s19] sm:$0xff]   ;;  %v2176_v9 = vunpack.c.h.bf16 %v2233_v1  ;;  %v2172_v12 = vunpack.c.h.bf16 %v2170_v4  ;;  %v2241_v15 = vld [vmem:[%s2569_s19 + $0x10] sm:$0xff]   ;;  %s2960_s14 = scalar_lea.vmem %s3409_s3, %s2131_s28  ;;  %s2464_s20 = smov 64  }
  0x1c   : > { %v2207_v6 = vunpack.c.l.bf16 %v2240_v2  ;;  %v2203_v10 = vunpack.c.l.bf16 %v2202_v8  ;;  %v2208_v11 = vunpack.c.h.bf16 %v2240_v2  ;;  %v2204_v13 = vunpack.c.h.bf16 %v2202_v8  ;;  %v2235_v20 = vld [vmem:[%s2564_s16 + $0x18] sm:$0xff]   ;;  %v2236_v40 = vld [vmem:[%s2564_s16 + $0x20] sm:$0xff]   ;;  %v2237_v48 = vld [vmem:[%s2564_s16 + $0x28] sm:$0xff]   ;;  %s2465_s13 = smov 32  }
  0x1d   : > { %v2242_v21 = vld [vmem:[%s2569_s19 + $0x18] sm:$0xff]   ;;  %v2179_v22 = vunpack.c.l.bf16 %v2234_v14  ;;  %v2211_v23 = vunpack.c.l.bf16 %v2241_v15  ;;  %v2184_v29 = vunpack.c.h.bf16 %v2235_v20  ;;  %v2183_v32 = vunpack.c.l.bf16 %v2235_v20  ;;  %v2243_v41 = vld [vmem:[%s2569_s19 + $0x20] sm:$0xff]   ;;  %v2244_v49 = vld [vmem:[%s2569_s19 + $0x28] sm:$0xff]  }
  0x1e   : > { %v2580_v16 = vadd.f32 %v2207_v6, %v2175_v5  ;;  %v2582_v17 = vadd.f32 %v2203_v10, %v2171_v7  ;;  %v2586_v19 = vadd.f32 %v2208_v11, %v2176_v9  ;;  %v2592_v25 = vadd.f32 %v2204_v13, %v2172_v12  ;;  %v2238_v63 = vld [vmem:[%s2564_s16 + $0x30] sm:$0xff]   ;;  %v2239_v20 = vld [vmem:[%s2564_s16 + $0x38] sm:$0xff]  }
  0x1f   : > { %v2595_v27 = vadd.f32 %v2211_v23, %v2179_v22  ;;  %v2216_v30 = vunpack.c.h.bf16 %v2242_v21  ;;  %v2215_v35 = vunpack.c.l.bf16 %v2242_v21  ;;  %v2180_v36 = vunpack.c.h.bf16 %v2234_v14  ;;  %v2245_v1 = vld [vmem:[%s2569_s19 + $0x30] sm:$0xff]   ;;  %v2246_v21 = vld [vmem:[%s2569_s19 + $0x38] sm:$0xff]   ;;  %s1866_s19 = scalar_lea.hbm %s3412_s6, %s2552_s9 }
  0x20   : > { %v406_v18 = vmul.f32 %v2574_v3, %v2580_v16  ;;  %v404_v24 = vmul.f32 %v2574_v3, %v2582_v17  ;;  %v407_v31 = vmul.f32 %v2574_v3, %v2586_v19  ;;  %v405_v34 = vmul.f32 %v2574_v3, %v2592_v25  ;;  %s1869_s28 = sshll.u32 %s1866_s19, 4  ;;  %s1870_s28 = int_to_ptr.hbm [resolvable:$true] %s1869_s28 }
  0x21   : > { %v408_v33 = vmul.f32 %v2574_v3, %v2595_v27  ;;  %v2212_v37 = vunpack.c.h.bf16 %v2241_v15  ;;  %v2605_v39 = vadd.f32 %v2216_v30, %v2184_v29  ;;  %v2187_v44 = vunpack.c.l.bf16 %v2236_v40  ;;  %s2413_s25 = sshra.s32 %s1870_s28, 4  ;;  %s2414_s25 = int_to_ptr.hbm [resolvable:$true] %s2413_s25 }
  0x22   : > { %v427_v26 = vsel %vm420_vm0, %v406_v18, 0.0  ;;  %v421_v28 = vsel %vm420_vm0, %v404_v24, 0.0  ;;  %v430_v43 = vsel %vm420_vm0, %v407_v31, 0.0  ;;  %v2219_v45 = vunpack.c.l.bf16 %v2243_v41  ;;  %s2415_s11 = scalar_lea.hbm %s2414_s25, 16  ;;  %p2420_p1 = scmp.lt.s32.totalorder %s2414_s25, %s3412_s6 }
  0x23   : > { %428 = vadd.xlane.f32.xlu1 %v427_v26  ;;  %422 = vadd.xlane.f32.xlu0 %v421_v28  ;;  %v433_v38 = vsel %vm420_vm0, %v408_v33, 0.0  ;;  %v2609_v42 = vadd.f32 %v2212_v37, %v2180_v36  ;;  %v424_v46 = vsel %vm420_vm0, %v405_v34, 0.0  ;;  %v2613_v47 = vadd.f32 %v2215_v35, %v2183_v32  ;;  %p2416_p12 = scmp.ne.s32.totalorder %s2414_s25, %s2415_s11  ;;  %p2421_p2 = scmp.lt.s32.totalorder %s2419_s12, %s2415_s11 }
  0x24   : > { %434 = vadd.xlane.f32.xlu2 %v433_v38  ;;  %v411_v51 = vmul.f32 %v2574_v3, %v2605_v39  ;;  %v2191_v52 = vunpack.c.l.bf16 %v2237_v48  ;;  %v2223_v53 = vunpack.c.l.bf16 %v2244_v49  ;;  %v2622_v55 = vadd.f32 %v2219_v45, %v2187_v44 }
  0x25   : > { %v409_v50 = vmul.f32 %v2574_v3, %v2609_v42  ;;  %v410_v56 = vmul.f32 %v2574_v3, %v2613_v47  ;;  %v2188_v57 = vunpack.c.h.bf16 %v2236_v40  ;;  %v2220_v58 = vunpack.c.h.bf16 %v2243_v41  ;;  %p2417_p13 = pnand %p2416_p12, %p2541_p5  ;;  %p2422_p3 = por %p2421_p2, %p2420_p1 }
  0x26   : > { %3433 = vst [vmem:[#allocation5_spill] sm:$0xff] %v2622_v55  ;;  %v442_v60 = vsel %vm420_vm0, %v411_v51, 0.0  ;;  %v2630_v62 = vadd.f32 %v2223_v53, %v2191_v52  ;;  %v412_v2 = vmul.f32 %v2574_v3, %v2622_v55  ;;  %v2192_v4 = vunpack.c.h.bf16 %v2237_v48 }
  0x27   : > { %v436_v54 = vsel %vm420_vm0, %v409_v50, 0.0  ;;  %v2224_v5 = vunpack.c.h.bf16 %v2244_v49  ;;  %v439_v6 = vsel %vm420_vm0, %v410_v56, 0.0  ;;  %v2637_v7 = vadd.f32 %v2220_v58, %v2188_v57  ;;  %p2418_p0 = pneg %p2417_p13 }
  0x28   : > { %3434 = vst [vmem:[#allocation6_spill] sm:$0xff] %v2630_v62  ;;  %v2196_v8 = vunpack.c.h.bf16 %v2238_v63  ;;  %v2228_v9 = vunpack.c.h.bf16 %v2245_v1  ;;  %v414_v10 = vmul.f32 %v2574_v3, %v2630_v62  ;;  %v445_v11 = vsel %vm420_vm0, %v412_v2, 0.0  ;;  %v1986_v62 = vld [vmem:[%s2960_s14 + $0x10] sm:$0xf0] }
  0x29   : > { %3435 = vst [vmem:[#allocation7_spill] sm:$0xff] %v2637_v7  ;;  %v2645_v12 = vadd.f32 %v2224_v5, %v2192_v4  ;;  %v413_v13 = vmul.f32 %v2574_v3, %v2637_v7  ;;  %v2195_v14 = vunpack.c.l.bf16 %v2238_v63  ;;  %v2227_v15 = vunpack.c.l.bf16 %v2245_v1  ;;  %p2423_p4 = pnand %p2422_p3, %p2418_p0 }
  0x2a   : > { %v2649_v18 = vadd.f32 %v2228_v9, %v2196_v8  ;;  %v451_v22 = vsel %vm420_vm0, %v414_v10, 0.0  ;;  %v2199_v24 = vunpack.c.l.bf16 %v2239_v20  ;;  %v2231_v26 = vunpack.c.l.bf16 %v2246_v21 }
  0x2b   : > { %431 = vadd.xlane.f32.xlu1 %v430_v43  ;;  %425 = vadd.xlane.f32.xlu0 %v424_v46  ;;  %3436 = vst [vmem:[#allocation8_spill] sm:$0xff] %v2645_v12  ;;  %v415_v23 = vmul.f32 %v2574_v3, %v2645_v12  ;;  %v448_v28 = vsel %vm420_vm0, %v413_v13, 0.0  ;;  %v2657_v29 = vadd.f32 %v2227_v15, %v2195_v14  ;;  %v2200_v34 = vunpack.c.h.bf16 %v2239_v20  ;;  %v1138_v46 = vld [vmem:[%s2683_s10] sm:$0xff] }
  0x2c   : > { %437 = vadd.xlane.f32.xlu2 %v436_v54  ;;  %3437 = vst [vmem:[#allocation9_spill] sm:$0xff] %v2649_v18  ;;  %v417_v30 = vmul.f32 %v2574_v3, %v2649_v18  ;;  %v2662_v32 = vadd.f32 %v2231_v26, %v2199_v24  ;;  %v2232_v35 = vunpack.c.h.bf16 %v2246_v21  ;;  %v469_v45 = vperm.slane %v2559_v0, 1 }
  0x2d   : > { %3438 = vst [vmem:[#allocation10_spill] sm:$0xff] %v2657_v29  ;;  %v454_v31 = vsel %vm420_vm0, %v415_v23, 0.0  ;;  %v416_v33 = vmul.f32 %v2574_v3, %v2657_v29  ;;  %v1154_v48 = vperm.slane %v1138_v46, 2  ;;  %v1147_v50 = vperm.slane %v1138_v46, 1 }
  0x2e   : > { %3439 = vst [vmem:[#allocation11_spill] sm:$0xff] %v2662_v32  ;;  %v460_v36 = vsel %vm420_vm0, %v417_v30, 0.0  ;;  %v418_v37 = vmul.f32 %v2574_v3, %v2662_v32  ;;  %v2670_v40 = vadd.f32 %v2232_v35, %v2200_v34  ;;  %v1140_v51 = vperm.slane %v1138_v46, 0 }
  0x2f   : > { %v457_v38 = vsel %vm420_vm0, %v416_v33, 0.0  ;;  %v1161_v57 = vperm.slane %v1138_v46, 3  ;;  %v1175_v58 = vperm.slane %v1138_v46, 5  ;;  %v1168_v63 = vperm.slane %v1138_v46, 4 }
  0x30   : > { %3440 = vst [vmem:[#allocation12_spill] sm:$0xff] %v2670_v40  ;;  %v463_v41 = vsel %vm420_vm0, %v418_v37, 0.0  ;;  %v419_v43 = vmul.f32 %v2574_v3, %v2670_v40  ;;  %v1139_v3 = vld [vmem:[%s2683_s10 + $0x8] sm:$0xff]  ;;  %v2463_v23 = vmov 0   ;;  %v2703_v24 = vrot.slane %v2559_v0, 4 }
  0x31   : > { %v1203_v49 = vperm.slane %v1139_v3, 1  ;;  %v1196_v52 = vperm.slane %v1139_v3, 0  ;;  %v1210_v53 = vperm.slane %v1139_v3, 2  ;;  %v1217_v54 = vperm.slane %v1139_v3, 3 }
  0x32   : > { %v466_v44 = vsel %vm420_vm0, %v419_v43, 0.0  ;;  %v1224_v56 = vperm.slane %v1139_v3, 4  ;;  %v1231_v1 = vperm.slane %v1139_v3, 5 }
  0x33   : > { %443 = vadd.xlane.f32.xlu1 %v442_v60  ;;  %440 = vadd.xlane.f32.xlu0 %v439_v6  ;;  %v1182_v60 = vperm.slane %v1138_v46, 6 }
  0x34   : > { %446 = vadd.xlane.f32.xlu2 %v445_v11 }
  0x3b   : > { %452 = vadd.xlane.f32.xlu1 %v451_v22  ;;  %449 = vadd.xlane.f32.xlu0 %v448_v28 }
  0x3c   : > { %455 = vadd.xlane.f32.xlu2 %v454_v31 }
  0x43   : > { %461 = vadd.xlane.f32.xlu1 %v460_v36  ;;  %458 = vadd.xlane.f32.xlu0 %v457_v38 }
  0x44   : > { %464 = vadd.xlane.f32.xlu2 %v463_v41 }
  0x4b   : > { %467 = vadd.xlane.f32.xlu0 %v466_v44 }
  0x5c   : > { %475 = vperm.xlu1 %2291, %v469_v45   ;;  %1159 = vperm.xlu2 %2293, %v1154_v48  }
  0x5f   : > { %1208 = vperm.xlu0 %2292, %v1203_v49  }
  0x64   : > { %1152 = vperm.xlu1 %2291, %v1147_v50   ;;  %1145 = vperm.xlu2 %2293, %v1140_v51  }
  0x67   : > { %1201 = vperm.xlu0 %2292, %v1196_v52  }
  0x6c   : > { %1215 = vperm.xlu1 %2291, %v1210_v53   ;;  %1222 = vperm.xlu2 %2293, %v1217_v54  }
  0x6f   : > { %1229 = vperm.xlu0 %2292, %v1224_v56  }
  0x74   : > { %1166 = vperm.xlu1 %2291, %v1161_v57   ;;  %1180 = vperm.xlu2 %2293, %v1175_v58  }
  0x77   : > { %1187 = vperm.xlu0 %2292, %v1182_v60  }
  0x7c   : > { %1173 = vperm.xlu1 %2291, %v1168_v63   ;;  %2294 = vset.pattern.permute.xlu2 %v2463_v23 }
  0x7f   : > { %2295 = vset.pattern.permute.xlu0 %v2463_v23 }
  0x84   : > { %1236 = vperm.xlu1 %2291, %v1231_v1  }
  0x8c   : > { %2296 = vset.pattern.permute.xlu1 %v2463_v23 }
  0x96   : > { %v423_v2 = vpop.xlane.xlu0 %422  ;;  %v429_v5 = vpop.xlane.xlu1 %428 }
  0x97   : > { %v2688_v4 = vpop.xlane.xlu2 %434 }
  0x9e   : > { %v426_v6 = vpop.xlane.xlu0 %425  ;;  %v432_v9 = vpop.xlane.xlu1 %431 }
  0x9f   : > { %v438_v8 = vpop.xlane.xlu2 %437 }
  0xa6   : > { %v2690_v10 = vpop.xlane.xlu0 %440  ;;  %v444_v13 = vpop.xlane.xlu1 %443 }
  0xa7   : > { %v447_v11 = vpop.xlane.xlu2 %446 }
  0xae   : > { %v2694_v15 = vpop.xlane.xlu0 %449  ;;  %v2698_v21 = vpop.xlane.xlu1 %452 }
  0xaf   : > { %v2692_v14 = vpop.xlane.xlu2 %455 }
  0xb6   : > { %v2700_v22 = vpop.xlane.xlu0 %458  ;;  %v2705_v28 = vpop.xlane.xlu1 %461 }
  0xb7   : > { %v2696_v20 = vpop.xlane.xlu2 %464 }
  0xbe   : > { %v2708_v31 = vpop.xlane.xlu0 %467 }
  0xbf   : > { %v1160_v26 = vpop.permute.xlu2 %1159 }
  0xc0   : > { %v1257_v30 = vmul.f32 %v2703_v24, %v1160_v26 }
  0xc2   : > { %v1286_v33 = vsel %vm3427_vm1, %v1257_v30, 0.0 }
  0xc3   : > { %v1287_v35 = vrot.slane %v1286_v33, 4 }
  0xc5   : > { %v1288_v43 = vadd.f32 %v1287_v35, %v1286_v33 }
  0xc7   : > { %v1146_v34 = vpop.permute.xlu2 %1145  ;;  %v1289_v50 = vrot.slane %v1288_v43, 2 }
  0xc8   : > { %v1255_v48 = vmul.f32 %v2703_v24, %v1146_v34 }
  0xca   : > { %v1272_v58 = vsel %vm3427_vm1, %v1255_v48, 0.0 }
  0xce   : > { %v2711_v36 = vpop.permute.xlu1 %475 }
  0xcf   : > { %v481_v37 = vadd.f32 %v2711_v36, %v432_v9  ;;  %v478_v38 = vadd.f32 %v2711_v36, %v423_v2  ;;  %v479_v41 = vadd.f32 %v2711_v36, %v426_v6  ;;  %v1223_v45 = vpop.permute.xlu2 %1222  ;;  %v483_v3 = vadd.f32 %v2711_v36, %v438_v8 }
  0xd0   : > { %v480_v49 = vadd.f32 %v2711_v36, %v429_v5  ;;  %v1266_v52 = vmul.f32 %v2703_v24, %v1223_v45  ;;  %v486_v54 = vadd.f32 %v2711_v36, %v447_v11  ;;  %v485_v2 = vadd.f32 %v2711_v36, %v444_v13 }
  0xd1   : > { %2300 = vtanh.f32 %v481_v37  ;;  %v1209_v44 = vpop.permute.xlu0 %1208  ;;  %v1290_v6 = vadd.f32 %v1289_v50, %v1288_v43  ;;  %v1273_v11 = vrot.slane %v1272_v58, 4 }
  0xd2   : > { %2302 = vtanh.f32 %v478_v38  ;;  %v1264_v46 = vmul.f32 %v2703_v24, %v1209_v44  ;;  %v1349_v9 = vsel %vm3427_vm1, %v1266_v52, 0.0 }
  0xd3   : > { %2304 = vtanh.f32 %v479_v41  ;;  %v1350_v41 = vrot.slane %v1349_v9, 4  ;;  %v1291_v13 = vrot.slane %v1290_v6, 1  ;;  %v1274_v45 = vadd.f32 %v1273_v11, %v1272_v58 }
  0xd4   : > { %v1335_v51 = vsel %vm3427_vm1, %v1264_v46, 0.0  ;;  %2306 = vtanh.f32 %v483_v3 }
  0xd5   : > { %v1336_v63 = vrot.slane %v1335_v51, 4  ;;  %2308 = vtanh.f32 %v480_v49 }
  0xd6   : > { %v1153_v53 = vpop.permute.xlu1 %1152  ;;  %2310 = vtanh.f32 %v486_v54  ;;  %v1351_v54 = vadd.f32 %v1350_v41, %v1349_v9 }
  0xd7   : > { %v2301_v56 = vpop.eup %2300  ;;  %v1256_v57 = vmul.f32 %v2703_v24, %v1153_v53  ;;  %v1337_v37 = vadd.f32 %v1336_v63, %v1335_v51  ;;  %v2732_v53 = vperm.slane %v2559_v0, 2 }
  0xd8   : > { %v2303_v60 = vpop.eup %2302  ;;  %v516_v1 = vmul.f32 1.442695, %v2301_v56 }
  0xd9   : > { %v2305_v5 = vpop.eup %2304  ;;  %v1279_v8 = vsel %vm3427_vm1, %v1256_v57, 0.0  ;;  %v510_v23 = vmul.f32 1.442695, %v2303_v60  ;;  %v1202_v30 = vpop.permute.xlu0 %1201  ;;  %3441 = vst [vmem:[#allocation13_spill] sm:$0xff] %v2732_v53  ;;  %v1338_v51 = vrot.slane %v1337_v37, 2  ;;  %v1292_v57 = vadd.f32 %v1291_v13, %v1290_v6 }
  0xda   : > { %v1280_v26 = vrot.slane %v1279_v8, 4  ;;  %v1263_v33 = vmul.f32 %v2703_v24, %v1202_v30  ;;  %2312 = vpow2.f32 %v516_v1  ;;  %v512_v34 = vmul.f32 1.442695, %v2305_v5  ;;  %v2307_v35 = vpop.eup %2306 }
  0xdb   : > { %2314 = vtanh.f32 %v485_v2  ;;  %v2309_v44 = vpop.eup %2308  ;;  %v520_v50 = vmul.f32 1.442695, %v2307_v35  ;;  %v1275_v2 = vrot.slane %v1274_v45, 2  ;;  %v1339_v11 = vadd.f32 %v1338_v51, %v1337_v37 }
  0xdc   : > { %v1281_v38 = vadd.f32 %v1280_v26, %v1279_v8  ;;  %v1328_v43 = vsel %vm3427_vm1, %v1263_v33, 0.0  ;;  %2316 = vpow2.f32 %v510_v23  ;;  %v2311_v52 = vpop.eup %2310  ;;  %v514_v58 = vmul.f32 1.442695, %v2309_v44 }
  0xdd   : > { %v1329_v3 = vrot.slane %v1328_v43, 4  ;;  %2318 = vpow2.f32 %v512_v34  ;;  %v482_v23 = vadd.f32 %v2711_v36, %v2688_v4  ;;  %v526_v6 = vmul.f32 1.442695, %v2311_v52 }
  0xde   : > { %v1216_v46 = vpop.permute.xlu1 %1215  ;;  %v1282_v48 = vrot.slane %v1281_v38, 2  ;;  %2320 = vpow2.f32 %v520_v50  ;;  %v1352_v33 = vrot.slane %v1351_v54, 2  ;;  %v489_v34 = vadd.f32 %v2711_v36, %v2692_v14 }
  0xdf   : > { %v1265_v49 = vmul.f32 %v2703_v24, %v1216_v46  ;;  %v1330_v60 = vadd.f32 %v1329_v3, %v1328_v43  ;;  %v2749_v41 = vadd.f32 %v2732_v53, %v1292_v57  ;;  %2322 = vpow2.f32 %v514_v58 }
  0xe0   : > { %v2734_v56 = vpop.eup %2312  ;;  %v1283_v26 = vadd.f32 %v1282_v48, %v1281_v38  ;;  %v1276_v13 = vadd.f32 %v1275_v2, %v1274_v45  ;;  %v488_v3 = vadd.f32 %v2711_v36, %v2698_v21  ;;  %2324 = vpow2.f32 %v526_v6 }
  0xe1   : > { %v1342_v63 = vsel %vm3427_vm1, %v1265_v49, 0.0  ;;  %v2315_v1 = vpop.eup %2314  ;;  %568 = vperm.xlu1 %2296, %v2734_v56   ;;  %v1230_v8 = vpop.permute.xlu0 %1229  ;;  %v1331_v4 = vrot.slane %v1330_v60, 2  ;;  %v1340_v49 = vrot.slane %v1339_v11, 1  ;;  %v1353_v52 = vadd.f32 %v1352_v33, %v1351_v54 }
  0xe2   : > { %v1343_v5 = vrot.slane %v1342_v63, 4  ;;  %v2740_v0 = vpop.eup %2316  ;;  %v1267_v9 = vmul.f32 %v2703_v24, %v1230_v8  ;;  %v524_v44 = vmul.f32 1.442695, %v2315_v1  ;;  %v1284_v46 = vrot.slane %v1283_v26, 1 }
  0xe3   : > { %559 = vperm.xlu2 %2294, %v2740_v0   ;;  %v2746_v35 = vpop.eup %2318  ;;  %v484_v51 = vadd.f32 %v2711_v36, %v2690_v10  ;;  %v1332_v57 = vadd.f32 %v1331_v4, %v1330_v60  ;;  %2326 = vtanh.f32 %v482_v23  ;;  %v1277_v1 = vrot.slane %v1276_v13, 1 }
  0xe4   : > { %v1344_v30 = vadd.f32 %v1343_v5, %v1342_v63  ;;  %v1356_v38 = vsel %vm3427_vm1, %v1267_v9, 0.0  ;;  %562 = vperm.xlu0 %2295, %v2746_v35   ;;  %v2758_v45 = vpop.eup %2320  ;;  %2328 = vpow2.f32 %v524_v44  ;;  %v1285_v8 = vadd.f32 %v1284_v46, %v1283_v26 }
  0xe5   : > { %v1357_v14 = vrot.slane %v1356_v38, 4  ;;  %v2762_v5 = vpop.eup %2322  ;;  %2330 = vtanh.f32 %v489_v34  ;;  %v492_v10 = vadd.f32 %v2711_v36, %v2696_v20  ;;  %v1354_v9 = vrot.slane %v1353_v52, 1 }
  0xe6   : > { %v1345_v43 = vrot.slane %v1344_v30, 2  ;;  %v1167_v37 = vpop.permute.xlu1 %1166  ;;  %2332 = vtanh.f32 %v488_v3  ;;  %v491_v23 = vadd.f32 %v2711_v36, %v2705_v28  ;;  %v2769_v6 = vpop.eup %2324  ;;  %v1333_v33 = vrot.slane %v1332_v57, 1 }
  0xe7   : > { %v1258_v48 = vmul.f32 %v2703_v24, %v1167_v37  ;;  %v1358_v63 = vadd.f32 %v1357_v14, %v1356_v38  ;;  %v1278_v26 = vadd.f32 %v1277_v1, %v1276_v13  ;;  %2334 = vtanh.f32 %v484_v51 }
  0xe8   : > { %v1346_v50 = vadd.f32 %v1345_v43, %v1344_v30  ;;  %v1341_v30 = vadd.f32 %v1340_v49, %v1339_v11  ;;  %v487_v20 = vadd.f32 %v2711_v36, %v2694_v15  ;;  %v1386_v44 = vadd.f32 %v2732_v53, %v1285_v8 }
  0xe9   : > { %v1293_v58 = vsel %vm3427_vm1, %v1258_v48, 0.0  ;;  %574 = vperm.xlu1 %2296, %v2758_v45   ;;  %v1359_v54 = vrot.slane %v1358_v63, 2  ;;  %v2327_v37 = vpop.eup %2326  ;;  %2336 = vtanh.f32 %v492_v10  ;;  %v1355_v46 = vadd.f32 %v1354_v9, %v1353_v52 }
  0xea   : > { %v1347_v21 = vrot.slane %v1346_v50, 1  ;;  %v1294_v2 = vrot.slane %v1293_v58, 4  ;;  %v2776_v11 = vpop.eup %2328  ;;  %v518_v13 = vmul.f32 1.442695, %v2327_v37  ;;  %2338 = vtanh.f32 %v491_v23 }
  0xeb   : > { %565 = vperm.xlu2 %2294, %v2762_v5   ;;  %v1360_v38 = vadd.f32 %v1359_v54, %v1358_v63  ;;  %v2331_v48 = vpop.eup %2330  ;;  %v1394_v49 = vadd.f32 %v2732_v53, %v1341_v30  ;;  %v1402_v52 = vmax.f32 %v1386_v44, 0.0  ;;  %v1403_v9 = vmax.f32 %v2749_v41, 0.0 }
  0xec   : > { %v1295_v60 = vadd.f32 %v1294_v2, %v1293_v58  ;;  %v1348_v4 = vadd.f32 %v1347_v21, %v1346_v50  ;;  %583 = vperm.xlu0 %2295, %v2769_v6   ;;  %v1334_v50 = vadd.f32 %v1333_v33, %v1332_v57  ;;  %v2333_v63 = vpop.eup %2332  ;;  %v1385_v58 = vadd.f32 %v2732_v53, %v1278_v26 }
  0xed   : > { %v1361_v3 = vrot.slane %v1360_v38, 1  ;;  %2340 = vpow2.f32 %v518_v13  ;;  %v532_v8 = vmul.f32 1.442695, %v2331_v48  ;;  %v530_v54 = vmul.f32 1.442695, %v2333_v63  ;;  %v2335_v10 = vpop.eup %2334 }
  0xee   : > { %v1296_v43 = vrot.slane %v1295_v60, 2  ;;  %v1174_v34 = vpop.permute.xlu1 %1173  ;;  %v1395_v51 = vadd.f32 %v2732_v53, %v1348_v4  ;;  %v1396_v57 = vadd.f32 %v2732_v53, %v1355_v46  ;;  %2342 = vtanh.f32 %v487_v20 }
  0xef   : > { %v1259_v28 = vmul.f32 %v2703_v24, %v1174_v34  ;;  %v1362_v1 = vadd.f32 %v1361_v3, %v1360_v38  ;;  %v2337_v23 = vpop.eup %2336  ;;  %v1410_v30 = vmax.f32 %v1394_v49, 0.0  ;;  %v1393_v33 = vadd.f32 %v2732_v53, %v1334_v50 }
  0xf0   : > { %v1297_v14 = vadd.f32 %v1296_v43, %v1295_v60  ;;  %v1411_v4 = vmax.f32 %v1395_v51, 0.0  ;;  %2344 = vpow2.f32 %v532_v8  ;;  %v2339_v38 = vpop.eup %2338  ;;  %v1804_v37 = vrot.slane %v1402_v52, 7 }
  0xf1   : > { %v1300_v15 = vsel %vm3427_vm1, %v1259_v28, 0.0  ;;  %580 = vperm.xlu1 %2296, %v2776_v11   ;;  %v1397_v26 = vadd.f32 %v2732_v53, %v1362_v1  ;;  %2346 = vpow2.f32 %v530_v54  ;;  %v1401_v44 = vmax.f32 %v1385_v58, 0.0 }
  0xf2   : > { %v1298_v21 = vrot.slane %v1297_v14, 1  ;;  %v1301_v2 = vrot.slane %v1300_v15, 4  ;;  %v522_v3 = vmul.f32 1.442695, %v2335_v10  ;;  %v1806_v41 = vrot.slane %v1403_v9, 6 }
  0xf3   : > { %v1412_v28 = vmax.f32 %v1396_v57, 0.0  ;;  %v538_v13 = vmul.f32 1.442695, %v2337_v23  ;;  %v2787_v20 = vpop.eup %2340  ;;  %v1818_v48 = vrot.slane %v1410_v30, 7  ;;  %v536_v49 = vmul.f32 1.442695, %v2339_v38 }
  0xf4   : > { %v1302_v60 = vadd.f32 %v1301_v2, %v1300_v15  ;;  %v1299_v43 = vadd.f32 %v1298_v21, %v1297_v14  ;;  %v490_v50 = vadd.f32 %v2711_v36, %v2700_v22  ;;  %v2343_v51 = vpop.eup %2342  ;;  %v1409_v15 = vmax.f32 %v1393_v33, 0.0  ;;  %571 = vperm.xlu2 %2294, %v2787_v20  }
  0xf5   : > { %v1820_v14 = vrot.slane %v1411_v4, 6  ;;  %v1413_v63 = vmax.f32 %v1397_v26, 0.0  ;;  %2348 = vpow2.f32 %v522_v3  ;;  %v1805_v2 = vsel %vm3430_vm2, %v1804_v37, %v1401_v44 }
  0xf6   : > { %v1303_v34 = vrot.slane %v1302_v60, 2  ;;  %v1388_v1 = vadd.f32 %v2732_v53, %v1299_v43  ;;  %v2793_v58 = vpop.eup %2344  ;;  %v1822_v8 = vrot.slane %v1412_v28, 5  ;;  %2350 = vpow2.f32 %v538_v13 }
  0xf7   : > { %v2796_v52 = vpop.eup %2346  ;;  %592 = vperm.xlu0 %2295, %v2793_v58   ;;  %v1807_v22 = vsel %vm3429_vm3, %v1806_v41, %v1805_v2  ;;  %2352 = vpow2.f32 %v536_v49  ;;  %v1824_v54 = vrot.slane %v1413_v63, 4  ;;  %v1819_v9 = vsel %vm3430_vm2, %v1818_v48, %v1409_v15  ;;  %v2834_v63 = vpop.permute.xlu1 %1236 }
  0xf8   : > { %v1304_v46 = vadd.f32 %v1303_v34, %v1302_v60  ;;  %v1404_v10 = vmax.f32 %v1388_v1, 0.0  ;;  %2354 = vtanh.f32 %v490_v50  ;;  %v528_v60 = vmul.f32 1.442695, %v2343_v51  ;;  %v2832_v51 = vpop.permute.xlu2 %1180  ;;  %3444 = vst [vmem:[#allocation16_spill] sm:$0xff] %v2834_v63  ;;  %v2836_v1 = vpop.permute.xlu0 %1187 }
  0xf9   : > { %589 = vperm.xlu1 %2296, %v2796_v52   ;;  %v1821_v23 = vsel %vm3429_vm3, %v1820_v14, %v1819_v9  ;;  %v493_v38 = vadd.f32 %v2711_v36, %v2708_v31 }
  0xfa   : > { %v1305_v21 = vrot.slane %v1304_v46, 1  ;;  %v1823_v30 = vsel %vm3428_vm4, %v1822_v8, %v1821_v23  ;;  %v1808_v34 = vrot.slane %v1404_v10, 5  ;;  %2356 = vpow2.f32 %v528_v60 }
  0xfb   : > { %v2804_v33 = vpop.eup %2348  ;;  %v2812_v26 = vsel %vm3426_vm5, %v1824_v54, %v1823_v30  ;;  %2358 = vtanh.f32 %v493_v38  ;;  %v607_v8 = vand.u32 127, %v471_v59 }
  0xfc   : > { %v1306_v57 = vadd.f32 %v1305_v21, %v1304_v46  ;;  %v2806_v4 = vpop.eup %2350  ;;  %577 = vperm.xlu2 %2294, %v2804_v33   ;;  %3442 = vst [vmem:[#allocation14_spill] sm:$0xff] %v2812_v26  ;;  %v1809_v28 = vsel %vm3428_vm4, %v1808_v34, %v1807_v22 }
  0xfd   : > { %v2814_v43 = vpop.eup %2352 }
  0xfe   : > { %v1389_v37 = vadd.f32 %v2732_v53, %v1306_v57  ;;  %v2355_v44 = vpop.eup %2354 }
  0xff   : > { %601 = vperm.xlu0 %2295, %v2806_v4   ;;  %v534_v41 = vmul.f32 1.442695, %v2355_v44 }
 0x100   : > { %v1405_v3 = vmax.f32 %v1389_v37, 0.0  ;;  %v2820_v31 = vpop.eup %2356 }
 0x101   : > { %598 = vperm.xlu1 %2296, %v2814_v43   ;;  %2360 = vpow2.f32 %v534_v41  ;;  %v2359_v46 = vpop.eup %2358 }
 0x102   : > { %v1810_v36 = vrot.slane %v1405_v3, 4  ;;  %v540_v13 = vmul.f32 1.442695, %v2359_v46 }
 0x104   : > { %586 = vperm.xlu2 %2294, %v2820_v31   ;;  %v2824_v48 = vsel %vm3426_vm5, %v1810_v36, %v1809_v28  ;;  %2362 = vpow2.f32 %v540_v13 }
 0x105   : > { %3443 = vst [vmem:[#allocation15_spill] sm:$0xff] %v2824_v48 }
 0x107   : > { %v2826_v49 = vpop.eup %2360 }
 0x10a   : > { %v2829_v50 = vpop.eup %2362 }
 0x10c   : > { %595 = vperm.xlu2 %2294, %v2826_v49  }
 0x114   : > { %604 = vperm.xlu2 %2294, %v2829_v50  }
 0x13d   : > { %v560_v15 = vpop.permute.xlu2 %559 }
 0x13e   : > { %v608_v54 = vperm.slane %v560_v15, %v607_v8 }
 0x145   : > { %v566_v14 = vpop.permute.xlu2 %565 }
 0x146   : > { %v610_v9 = vperm.slane %v566_v14, %v607_v8 }
 0x14e   : > { %v572_v21 = vpop.permute.xlu2 %571 }
 0x14f   : > { %v612_v44 = vperm.slane %v572_v21, %v607_v8 }
 0x153   : > { %v569_v2 = vpop.permute.xlu1 %568 }
 0x154   : > { %v611_v38 = vperm.slane %v569_v2, %v607_v8 }
 0x156   : > { %v563_v22 = vpop.permute.xlu0 %562  ;;  %v578_v60 = vpop.permute.xlu2 %577 }
 0x157   : > { %v609_v10 = vperm.slane %v563_v22, %v607_v8  ;;  %v614_v28 = vperm.slane %v578_v60, %v607_v8 }
 0x159   : > { %v625_v57 = vsel %vm3430_vm2, %v609_v10, %v608_v54 }
 0x15a   : > { %v627_v23 = vsel %vm3429_vm3, %v610_v9, %v625_v57 }
 0x15b   : > { %v575_v30 = vpop.permute.xlu1 %574  ;;  %v629_v37 = vsel %vm3428_vm4, %v611_v38, %v627_v23 }
 0x15c   : > { %v613_v34 = vperm.slane %v575_v30, %v607_v8  ;;  %v631_v3 = vsel %vm3426_vm5, %v612_v44, %v629_v37 }
 0x15e   : > { %v633_v59 = vsel %vm3419_vm6, %v613_v34, %v631_v3  ;;  %v584_v41 = vpop.permute.xlu0 %583  ;;  %v587_v36 = vpop.permute.xlu2 %586 }
 0x15f   : > { %v635_v15 = vsel %vm3417_vm8, %v614_v28, %v633_v59  ;;  %v617_v22 = vperm.slane %v587_v36, %v607_v8  ;;  %v616_v54 = vperm.slane %v584_v41, %v607_v8 }
 0x161   : > { %v638_v60 = vsel %vm3430_vm2, %v617_v22, %v616_v54  ;;  %v2151_v22 = vld [vmem:[%s3411_s5 + $0x78] sm:$0xff]  ;;  %v2158_v54 = vld [vmem:[%s3411_s5 + $0xb0] sm:$0xff] }
 0x162   : > { %1712 = vmatpush.bf16.msra.mxu1 %v2151_v22 }
 0x163   : > { %v581_v46 = vpop.permute.xlu1 %580 }
 0x164   : > { %v615_v13 = vperm.slane %v581_v46, %v607_v8 }
 0x166   : > { %v637_v14 = vsel %vm3416_vm7, %v615_v13, %v635_v15  ;;  %v596_v21 = vpop.permute.xlu2 %595 }
 0x167   : > { %v648_v2 = vsel %vm647_vm9, %v637_v14, 0.0  ;;  %v620_v37 = vperm.slane %v596_v21, %v607_v8  ;;  %v2143_v21 = vld [vmem:[%s3411_s5 + $0x38] sm:$0xff] }
 0x168   : > { %649 = vadd.xlane.f32.xlu1 %v648_v2  ;;  %v2159_v2 = vld [vmem:[%s3411_s5 + $0xb8] sm:$0xff]  ;;  %1698 = vmatpush.bf16.msra.mxu0 %v2143_v21 }
 0x169   : > { %v593_v10 = vpop.permute.xlu0 %592  ;;  %1726 = vmatpush.bf16.msra.mxu2 %v2159_v2  ;;  %v2162_v2 = vld [vmem:[%s3411_s5 + $0xd0] sm:$0xff] }
 0x16a   : > { %v619_v30 = vperm.slane %v593_v10, %v607_v8  ;;  %v2142_v10 = vld [vmem:[%s3411_s5 + $0x30] sm:$0xff] }
 0x16b   : > { %v590_v9 = vpop.permute.xlu1 %589 }
 0x16c   : > { %v618_v57 = vperm.slane %v590_v9, %v607_v8  ;;  %v2166_v9 = vld [vmem:[%s3411_s5 + $0xf0] sm:$0xff]  ;;  %1699 = vmatpush.bf16.msra.mxu0 %v2142_v10  ;;  %v2153_v10 = vld [vmem:[%s3411_s5 + $0x88] sm:$0xff] }
 0x16d   : > { %1727 = vmatpush.bf16.msra.mxu2 %v2158_v54  ;;  %v2146_v54 = vld [vmem:[%s3411_s5 + $0x50] sm:$0xff] }
 0x16e   : > { %v639_v23 = vsel %vm3429_vm3, %v618_v57, %v638_v60  ;;  %v605_v44 = vpop.permute.xlu2 %604  ;;  %v2150_v57 = vld [vmem:[%s3411_s5 + $0x70] sm:$0xff]  ;;  %v2157_v60 = vld [vmem:[%s3411_s5 + $0xa8] sm:$0xff] }
 0x16f   : > { %v640_v38 = vsel %vm3428_vm4, %v619_v30, %v639_v23  ;;  %v623_v36 = vperm.slane %v605_v44, %v607_v8  ;;  %v2141_v23 = vld [vmem:[%s3411_s5 + $0x28] sm:$0xff]  ;;  %1713 = vmatpush.bf16.msra.mxu1 %v2150_v57  ;;  %v2164_v44 = vld [vmem:[%s3411_s5 + $0xe0] sm:$0xff] }
 0x170   : > { %v641_v46 = vsel %vm3426_vm5, %v620_v37, %v640_v38  ;;  %v2165_v30 = vld [vmem:[%s3411_s5 + $0xe8] sm:$0xff]  ;;  %1700 = vmatpush.bf16.msra.mxu0 %v2141_v23  ;;  %v2140_v37 = vld [vmem:[%s3411_s5 + $0x20] sm:$0xff] }
 0x171   : > { %v602_v34 = vpop.permute.xlu0 %601  ;;  %1728 = vmatpush.bf16.msra.mxu2 %v2157_v60  ;;  %v2149_v38 = vld [vmem:[%s3411_s5 + $0x68] sm:$0xff] }
 0x172   : > { %v622_v28 = vperm.slane %v602_v34, %v607_v8  ;;  %v2156_v34 = vld [vmem:[%s3411_s5 + $0xa0] sm:$0xff]  ;;  %v2137_v57 = vld [vmem:[%s3411_s5 + $0x8] sm:$0xff] }
 0x173   : > { %v599_v3 = vpop.permute.xlu1 %598  ;;  %1714 = vmatpush.bf16.msra.mxu1 %v2149_v38  ;;  %v2161_v60 = vld [vmem:[%s3411_s5 + $0xc8] sm:$0xff] }
 0x174   : > { %v621_v59 = vperm.slane %v599_v3, %v607_v8  ;;  %v2167_v8 = vld [vmem:[%s3411_s5 + $0xf8] sm:$0xff]  ;;  %v2148_v3 = vld [vmem:[%s3411_s5 + $0x60] sm:$0xff]  ;;  %1701 = vmatpush.bf16.msra.mxu0 %v2140_v37 }
 0x175   : > { %1740 = vmatpush.bf16.msra.mxu3 %v2167_v8  ;;  %1729 = vmatpush.bf16.msra.mxu2 %v2156_v34  ;;  %v2145_v34 = vld [vmem:[%s3411_s5 + $0x48] sm:$0xff]  ;;  %v2152_v37 = vld [vmem:[%s3411_s5 + $0x80] sm:$0xff] }
 0x176   : > { %v642_v41 = vsel %vm3419_vm6, %v621_v59, %v641_v46  ;;  %v2155_v59 = vld [vmem:[%s3411_s5 + $0x98] sm:$0xff] }
 0x177   : > { %v643_v13 = vsel %vm3417_vm8, %v622_v28, %v642_v41  ;;  %v2139_v28 = vld [vmem:[%s3411_s5 + $0x18] sm:$0xff]  ;;  %1715 = vmatpush.bf16.msra.mxu1 %v2148_v3 }
 0x178   : > { %v644_v15 = vsel %vm3416_vm7, %v623_v36, %v643_v13  ;;  %v2163_v46 = vld [vmem:[%s3411_s5 + $0xd8] sm:$0xff]  ;;  %v2154_v13 = vld [vmem:[%s3411_s5 + $0x90] sm:$0xff]  ;;  %1702 = vmatpush.bf16.msra.mxu0 %v2139_v28  ;;  %v2160_v28 = vld [vmem:[%s3411_s5 + $0xc0] sm:$0xff] }
 0x179   : > { %v651_v14 = vsel %vm647_vm9, %v644_v15, 0.0  ;;  %1741 = vmatpush.bf16.msra.mxu3 %v2166_v9  ;;  %1730 = vmatpush.bf16.msra.mxu2 %v2155_v59  ;;  %v2147_v41 = vld [vmem:[%s3411_s5 + $0x58] sm:$0xff]  ;;  %v2136_v59 = vld [vmem:[%s3411_s5] sm:$0xff] }
 0x17a   : > { %652 = vadd.xlane.f32.xlu0 %v651_v14  ;;  %v2138_v14 = vld [vmem:[%s3411_s5 + $0x10] sm:$0xff] }
 0x17b   : > { %1716 = vmatpush.bf16.msra.mxu1 %v2147_v41  ;;  %v2135_v41 = vld [vmem:[%s2960_s14 + $0x14] sm:$0xf0] }
 0x17c   : > { %1703 = vmatpush.bf16.msra.mxu0 %v2138_v14 }
 0x17d   : > { %1742 = vmatpush.bf16.msra.mxu3 %v2165_v30  ;;  %1731 = vmatpush.bf16.msra.mxu2 %v2154_v13 }
 0x17f   : > { %1717 = vmatpush.bf16.msra.mxu1 %v2146_v54 }
 0x180   : > { %1704 = vmatpush.bf16.msra.mxu0 %v2137_v57 }
 0x181   : > { %1743 = vmatpush.bf16.msra.mxu3 %v2164_v44  ;;  %1732 = vmatpush.bf16.msra.mxu2 %v2153_v10 }
 0x183   : > { %1718 = vmatpush.bf16.msra.mxu1 %v2145_v34 }
 0x184   : > { %1705 = vmatpush.bf16.msra.mxu0 %v2136_v59 }
 0x185   : > { %1744 = vmatpush.bf16.msra.mxu3 %v2163_v46  ;;  %1733 = vmatpush.bf16.msra.mxu2 %v2152_v37 }
 0x189   : > { %1745 = vmatpush.bf16.msra.mxu3 %v2162_v2 }
 0x18d   : > { %1746 = vmatpush.bf16.msra.mxu3 %v2161_v60 }
 0x191   : > { %1747 = vmatpush.bf16.msra.mxu3 %v2160_v28  ;;  %v2144_v28 = vld [vmem:[%s3411_s5 + $0x40] sm:$0xff] }
 0x192   : > { %1719 = vmatpush.bf16.msra.mxu1 %v2144_v28 }
 0x1db   : > { %v650_v36 = vpop.xlane.xlu1 %649 }
 0x1dc   : > { %v2918_v15 = vadd.f32 1e-10, %v650_v36  ;;  %v1992_v36 = vld [vmem:[%s2960_s14 + $0x8] sm:$0xf] }
 0x1dd   : > { %v1993_v60 = vor.u32 %v2135_v41, %v1992_v36 }
 0x1de   : > { %v2927_v21 = vperm.slane %v2918_v15, 5  ;;  %v2930_v8 = vperm.slane %v2918_v15, 0  ;;  %v2933_v22 = vperm.slane %v2918_v15, 7  ;;  %v2944_v9 = vperm.slane %v2918_v15, 1 }
 0x1df   : > { %v2954_v23 = vperm.slane %v2918_v15, 2  ;;  %1734 = vmatmul.bf16.vlgmr.msra.gmra.mxu2 %v1993_v60  ;;  %v3030_v29 = vperm.slane %v2918_v15, 3 }
 0x1e0   : > { %2364 = vrcp.f32 %v2927_v21  ;;  %v774_v30 = vand.u32 2147483647, %v2927_v21  ;;  %v776_v38 = vand.u32 2147483648, %v2927_v21  ;;  %v699_v44 = vand.u32 2147483647, %v2930_v8 }
 0x1e1   : > { %2366 = vrcp.f32 %v2930_v8  ;;  %v701_v3 = vand.u32 2147483648, %v2930_v8  ;;  %v804_v46 = vand.u32 2147483647, %v2933_v22  ;;  %vm770_vm10 = vweird.f32 %v2927_v21 }
 0x1e2   : > { %2368 = vrcp.f32 %v2933_v22  ;;  %vm695_vm11 = vweird.f32 %v2930_v8  ;;  %v806_v14 = vand.u32 2147483648, %v2933_v22  ;;  %vm2992_vm12 = vcmp.eq.f32.partialorder %v774_v30, 8.507059e+37 }
 0x1e3   : > { %2370 = vrcp.f32 %v2944_v9  ;;  %v777_v57 = vor.u32 1.1754944e-38, %v776_v38  ;;  %vm800_vm13 = vweird.f32 %v2933_v22  ;;  %vm3001_vm14 = vcmp.eq.f32.partialorder %v699_v44, 8.507059e+37  ;;  %v2133_v44 = vld [vmem:[%s2960_s14 + $0xc] sm:$0xf] }
 0x1e4   : > { %2372 = vrcp.f32 %v2954_v23  ;;  %v702_v40 = vor.u32 1.1754944e-38, %v701_v3  ;;  %vm3008_vm15 = vcmp.eq.f32.partialorder %v804_v46, 8.507059e+37  ;;  %v807_v59 = vor.u32 1.1754944e-38, %v806_v14  ;;  %v1984_v46 = vld [vmem:[%s2960_s14] sm:$0xf] }
 0x1e5   : > { %vm710_vm8 = vweird.f32 %v2944_v9  ;;  %v2134_v14 = vld [vmem:[%s2960_s14 + $0xc] sm:$0xf0]  ;;  %2374 = vrcp.f32 %v3030_v29  ;;  %v731_v53 = vand.u32 2147483648, %v2954_v23  ;;  %v3453_v37 = vand.u32 2147483648, %v2944_v9 }
 0x1e6   : > { %v2983_v13 = vpop.eup %2364  ;;  %v1985_v32 = vor.u32 %v2134_v14, %v1984_v46 }
 0x1e7   : > { %v2988_v2 = vpop.eup %2366  ;;  %v766_v54 = vmul.f32 %v2983_v13, %v2927_v21  ;;  %vm771_vm9 = vweird.f32 %v2983_v13 }
 0x1e8   : > { %v2997_v26 = vpop.eup %2368  ;;  %v691_v48 = vmul.f32 %v2988_v2, %v2930_v8  ;;  %vm696_vm7 = vweird.f32 %v2988_v2  ;;  %vm772_vm5 = vmor %vm770_vm10, %vm771_vm9  ;;  %1706 = vmatmul.bf16.vlgmr.msra.gmra.mxu0 %v1985_v32 }
 0x1e9   : > { %v767_v38 = vsub.f32 1.0, %v766_v54  ;;  %v796_v34 = vmul.f32 %v2997_v26, %v2933_v22  ;;  %v3013_v36 = vpop.eup %2370  ;;  %vm801_vm6 = vweird.f32 %v2997_v26  ;;  %vm697_vm4 = vmor %vm695_vm11, %vm696_vm7  ;;  %vm740_vm11 = vweird.f32 %v3030_v29 }
 0x1ea   : > { %v692_v3 = vsub.f32 1.0, %v691_v48  ;;  %v3022_v41 = vpop.eup %2372  ;;  %v706_v48 = vmul.f32 %v3013_v36, %v2944_v9  ;;  %vm711_vm1 = vweird.f32 %v3013_v36 }
 0x1eb   : > { %v768_v54 = vmul.f32 %v2983_v13, %v767_v38  ;;  %v797_v30 = vsub.f32 1.0, %v796_v34  ;;  %v721_v63 = vmul.f32 %v3022_v41, %v2954_v23  ;;  %v1994_v38 = vld [vmem:[%s2960_s14 + $0x18] sm:$0xf0]  ;;  %v2132_v34 = vld [vmem:[%s2960_s14 + $0x4] sm:$0xf]  ;;  %vm726_vm7 = vweird.f32 %v3022_v41  ;;  %s293_s14 = sand.u32 1, %s2453_s22  }
 0x1ec   : > { %v693_v60 = vmul.f32 %v2988_v2, %v692_v3  ;;  %v707_v12 = vsub.f32 1.0, %v706_v48  ;;  %v1997_v55 = vor.u32 %v2133_v44, %v1994_v38  ;;  %v1989_v46 = vor.u32 %v2132_v34, %v1986_v62  ;;  %s1972_s15 = sshll.u32 %s293_s14, 4  ;;  %s1855_s29 = scalar_lea.sflag [#allocation3], %s293_s14 }
 0x1ed   : > { %v769_v18 = vadd.f32 %v2983_v13, %v768_v54  ;;  %v798_v7 = vmul.f32 %v2997_v26, %v797_v30  ;;  %v722_v28 = vsub.f32 1.0, %v721_v63  ;;  %v653_v21 = vpop.xlane.xlu0 %652  ;;  %v3111_v38 = vperm.slane %v2918_v15, 4  ;;  %s295_s16 = scalar_lea.vmem [#allocation2], %s1972_s15 }
 0x1ee   : > { %v694_v3 = vadd.f32 %v2988_v2, %v693_v60  ;;  %v708_v44 = vmul.f32 %v3013_v36, %v707_v12  ;;  %1748 = vmatmul.bf16.vlgmr.msra.gmra.mxu3 %v1997_v55  ;;  %1720 = vmatmul.bf16.vlgmr.msra.gmra.mxu1 %v1989_v46  ;;  %v732_v60 = vor.u32 1.1754944e-38, %v731_v53  ;;  %s1867_s26 = sshll.u32 %s295_s16, 4  ;;  %s1868_s26 = int_to_ptr.vmem [resolvable:$true] %s1867_s26 }
 0x1ef   : > { %v773_v14 = vsel %vm772_vm5, %v2983_v13, %v769_v18  ;;  %v799_v30 = vadd.f32 %v2997_v26, %v798_v7  ;;  %vm802_vm5 = vmor %vm800_vm13, %vm801_vm6  ;;  %v723_v18 = vmul.f32 %v3022_v41, %v722_v28  ;;  %v3064_v7 = vadd.f32 1e-10, %v653_v21 }
 0x1f0   : > { %v778_v63 = vsel %vm2992_vm12, %v777_v57, %v773_v14  ;;  %v698_v62 = vsel %vm697_vm4, %v2988_v2, %v694_v3  ;;  %v709_v13 = vadd.f32 %v3013_v36, %v708_v44  ;;  %vm3080_vm4 = vmor %vm710_vm8, %vm711_vm1  ;;  %vm725_vm6 = vweird.f32 %v2954_v23  ;;  %v3096_v57 = vpop.eup %2374 }
 0x1f1   : > { %v779_v55 = vmul.f32 %v2758_v45, %v778_v63  ;;  %v703_v12 = vsel %vm3001_vm14, %v702_v40, %v698_v62  ;;  %v803_v32 = vsel %vm802_vm5, %v2997_v26, %v799_v30  ;;  %v724_v2 = vadd.f32 %v3022_v41, %v723_v18  ;;  %vm727_vm1 = vmor %vm725_vm6, %vm726_vm7 }
 0x1f2   : > { %v704_v8 = vmul.f32 %v2740_v0, %v703_v12  ;;  %v808_v22 = vsel %vm3008_vm15, %v807_v59, %v803_v32  ;;  %v3086_v0 = vperm.slane %v3064_v7, 3  ;;  %v3089_v45 = vperm.slane %v3064_v7, 2 }
 0x1f3   : > { %957 = vperm.xlu1 %2296, %v779_v55   ;;  %v809_v10 = vmul.f32 %v2776_v11, %v808_v22  ;;  %v713_v11 = vsel %vm3080_vm4, %v3013_v36, %v709_v13  ;;  %v729_v26 = vand.u32 2147483647, %v2954_v23  ;;  %v717_v59 = vor.u32 1.1754944e-38, %v3453_v37 }
 0x1f4   : > { %932 = vperm.xlu2 %2294, %v704_v8   ;;  %2376 = vrcp.f32 %v3086_v0  ;;  %v3104_v54 = vperm.slane %v3064_v7, 6  ;;  %v3454_v36 = vand.u32 2147483647, %v2944_v9  ;;  %v728_v48 = vsel %vm727_vm1, %v3022_v41, %v724_v2 }
 0x1f5   : > { %967 = vperm.xlu0 %2295, %v809_v10   ;;  %2378 = vrcp.f32 %v3089_v45  ;;  %vm730_vm10 = vcmp.eq.f32.partialorder %v729_v26, 8.507059e+37  ;;  %v736_v34 = vmul.f32 %v3096_v57, %v3030_v29  ;;  %v3116_v3 = vperm.slane %v2918_v15, 6 }
 0x1f6   : > { %vm715_vm8 = vcmp.eq.f32.partialorder %v3454_v36, 8.507059e+37  ;;  %v733_v28 = vsel %vm730_vm10, %v732_v60, %v728_v48  ;;  %v864_v9 = vand.u32 2147483647, %v3086_v0  ;;  %v866_v46 = vand.u32 2147483648, %v3086_v0 }
 0x1f7   : > { %v718_v23 = vsel %vm715_vm8, %v717_v59, %v713_v11  ;;  %2380 = vrcp.f32 %v3104_v54  ;;  %v737_v14 = vsub.f32 1.0, %v736_v34  ;;  %v744_v30 = vand.u32 2147483647, %v3030_v29 }
 0x1f8   : > { %v719_v41 = vmul.f32 %v2746_v35, %v718_v23  ;;  %v746_v44 = vand.u32 2147483648, %v3030_v29  ;;  %v849_v15 = vand.u32 2147483647, %v3089_v45  ;;  %v851_v63 = vand.u32 2147483648, %v3089_v45 }
 0x1f9   : > { %v3128_v62 = vperm.slane %v3064_v7, 5  ;;  %2382 = vrcp.f32 %v3111_v38  ;;  %v734_v18 = vmul.f32 %v2762_v5, %v733_v28  ;;  %vm860_vm12 = vweird.f32 %v3086_v0 }
 0x1fa   : > { %v2377_v21 = vpop.eup %2376  ;;  %v738_v55 = vmul.f32 %v3096_v57, %v737_v14  ;;  %vm3135_vm13 = vcmp.eq.f32.partialorder %v864_v9, 8.507059e+37  ;;  %v867_v8 = vor.u32 1.1754944e-38, %v866_v46  ;;  %vm845_vm14 = vweird.f32 %v3089_v45 }
 0x1fb   : > { %v856_v35 = vmul.f32 %v2377_v21, %v3086_v0  ;;  %v2379_v12 = vpop.eup %2378  ;;  %2384 = vrcp.f32 %v3128_v62  ;;  %vm741_vm15 = vweird.f32 %v3096_v57  ;;  %vm3143_vm9 = vcmp.eq.f32.partialorder %v744_v30, 8.507059e+37 }
 0x1fc   : > { %937 = vperm.xlu2 %2294, %v719_v41   ;;  %v841_v13 = vmul.f32 %v2379_v12, %v3089_v45  ;;  %v909_v2 = vand.u32 2147483647, %v3104_v54  ;;  %vm3150_vm5 = vcmp.eq.f32.partialorder %v849_v15, 8.507059e+37  ;;  %v852_v53 = vor.u32 1.1754944e-38, %v851_v63  ;;  %vm3167_vm8 = vmor %vm740_vm11, %vm741_vm15 }
 0x1fd   : > { %v857_v22 = vsub.f32 1.0, %v856_v35  ;;  %v3148_v10 = vpop.eup %2380  ;;  %v739_v11 = vadd.f32 %v3096_v57, %v738_v55  ;;  %v747_v26 = vor.u32 1.1754944e-38, %v746_v44  ;;  %vm861_vm7 = vweird.f32 %v2377_v21 }
 0x1fe   : > { %v842_v59 = vsub.f32 1.0, %v841_v13  ;;  %v901_v36 = vmul.f32 %v3148_v10, %v3104_v54  ;;  %vm905_vm4 = vweird.f32 %v3104_v54  ;;  %v911_v23 = vand.u32 2147483648, %v3104_v54  ;;  %vm862_vm3 = vmor %vm860_vm12, %vm861_vm7 }
 0x1ff   : > { %v858_v37 = vmul.f32 %v2377_v21, %v857_v22  ;;  %v3157_v48 = vpop.eup %2382  ;;  %vm755_vm6 = vweird.f32 %v3111_v38  ;;  %v759_v60 = vand.u32 2147483647, %v3111_v38  ;;  %vm846_vm1 = vweird.f32 %v2379_v12 }
 0x200   : > { %v843_v28 = vmul.f32 %v2379_v12, %v842_v59  ;;  %v902_v46 = vsub.f32 1.0, %v901_v36  ;;  %vm3171_vm10 = vcmp.eq.f32.partialorder %v909_v2, 8.507059e+37  ;;  %v743_v30 = vsel %vm3167_vm8, %v3096_v57, %v739_v11  ;;  %vm847_vm11 = vmor %vm845_vm14, %vm846_vm1 }
 0x201   : > { %v859_v34 = vadd.f32 %v2377_v21, %v858_v37  ;;  %v2385_v14 = vpop.eup %2384  ;;  %vm906_vm2 = vweird.f32 %v3148_v10  ;;  %v751_v29 = vmul.f32 %v3157_v48, %v3111_v38  ;;  %2386 = vrcp.f32 %v3116_v3 }
 0x202   : > { %v844_v15 = vadd.f32 %v2379_v12, %v843_v28  ;;  %v903_v63 = vmul.f32 %v3148_v10, %v902_v46  ;;  %v886_v35 = vmul.f32 %v2385_v14, %v3128_v62  ;;  %v894_v57 = vand.u32 2147483647, %v3128_v62 }
 0x203   : > { %v863_v44 = vsel %vm862_vm3, %v2377_v21, %v859_v34  ;;  %v896_v55 = vand.u32 2147483648, %v3128_v62  ;;  %v752_v22 = vsub.f32 1.0, %v751_v29  ;;  %v748_v32 = vsel %vm3143_vm9, %v747_v26, %v743_v30  ;;  %vm3204_vm3 = vmor %vm905_vm4, %vm906_vm2 }
 0x204   : > { %942 = vperm.xlu2 %2294, %v734_v18   ;;  %v868_v0 = vsel %vm3135_vm13, %v867_v8, %v863_v44  ;;  %v848_v21 = vsel %vm847_vm11, %v2379_v12, %v844_v15  ;;  %v904_v13 = vadd.f32 %v3148_v10, %v903_v63  ;;  %v887_v2 = vsub.f32 1.0, %v886_v35 }
 0x205   : > { %v869_v18 = vmul.f32 %v2793_v58, %v868_v0  ;;  %v853_v11 = vsel %vm3150_vm5, %v852_v53, %v848_v21  ;;  %v753_v58 = vmul.f32 %v3157_v48, %v752_v22  ;;  %vm756_vm12 = vweird.f32 %v3157_v48 }
 0x206   : > { %v854_v12 = vmul.f32 %v2796_v52, %v853_v11  ;;  %v908_v8 = vsel %vm3204_vm3, %v3148_v10, %v904_v13  ;;  %v888_v5 = vmul.f32 %v2385_v14, %v887_v2  ;;  %vm891_vm13 = vweird.f32 %v2385_v14  ;;  %vm3225_vm14 = vmor %vm755_vm6, %vm756_vm12 }
 0x207   : > { %987 = vperm.xlu0 %2295, %v869_v18   ;;  %v2387_v40 = vpop.eup %2386  ;;  %v912_v53 = vor.u32 1.1754944e-38, %v911_v23  ;;  %v754_v54 = vadd.f32 %v3157_v48, %v753_v58  ;;  %v761_v26 = vand.u32 2147483648, %v3111_v38  ;;  %v3217_v37 = vperm.slane %v3064_v7, 0 }
 0x208   : > { %982 = vperm.xlu1 %2296, %v854_v12   ;;  %v749_v59 = vmul.f32 %v2734_v56, %v748_v32  ;;  %v889_v36 = vadd.f32 %v2385_v14, %v888_v5  ;;  %vm890_vm2 = vweird.f32 %v3128_v62  ;;  %v781_v10 = vmul.f32 %v2387_v40, %v3116_v3  ;;  %v2396_v12 = vld [vmem:[%s2683_s10 + $0x8] sm:$0xff] }
 0x209   : > { %v913_v23 = vsel %vm3171_vm10, %v912_v53, %v908_v8  ;;  %vm892_vm15 = vmor %vm890_vm2, %vm891_vm13  ;;  %v897_v34 = vor.u32 1.1754944e-38, %v896_v55  ;;  %2388 = vrcp.f32 %v3217_v37  ;;  %vm895_vm9 = vcmp.eq.f32.partialorder %v894_v57, 8.507059e+37  ;;  %v2397_v53 = vld [vmem:[%s2683_s10] sm:$0xff] }
 0x20a   : > { %v893_v56 = vsel %vm892_vm15, %v2385_v14, %v889_v36  ;;  %v758_v38 = vsel %vm3225_vm14, %v3157_v48, %v754_v54  ;;  %v782_v62 = vsub.f32 1.0, %v781_v10  ;;  %v762_v9 = vor.u32 1.1754944e-38, %v761_v26 }
 0x20b   : > { %v898_v28 = vsel %vm895_vm9, %v897_v34, %v893_v56  ;;  %v3237_v46 = vperm.slane %v3064_v7, 1  ;;  %v914_v41 = vmul.f32 %v2806_v4, %v913_v23  ;;  %vm760_vm5 = vcmp.eq.f32.partialorder %v759_v60, 8.507059e+37 }
 0x20c   : > { %947 = vperm.xlu2 %2294, %v749_v59   ;;  %v783_v30 = vmul.f32 %v2387_v40, %v782_v62  ;;  %v763_v29 = vsel %vm760_vm5, %v762_v9, %v758_v38  ;;  %v899_v14 = vmul.f32 %v2814_v43, %v898_v28  ;;  %vm786_vm7 = vweird.f32 %v2387_v40 }
 0x20d   : > { %2390 = vrcp.f32 %v3237_v46  ;;  %v3243_v48 = vperm.slane %v3064_v7, 4  ;;  %v791_v63 = vand.u32 2147483648, %v3116_v3  ;;  %v764_v35 = vmul.f32 %v2787_v20, %v763_v29 }
 0x20e   : > { %v784_v44 = vadd.f32 %v2387_v40, %v783_v30  ;;  %vm785_vm4 = vweird.f32 %v3116_v3  ;;  %v789_v4 = vand.u32 2147483647, %v3116_v3  ;;  %v3253_v20 = vperm.slane %v3064_v7, 7 }
 0x20f   : > { %1002 = vperm.xlu0 %2295, %v914_v41   ;;  %v2389_v15 = vpop.eup %2388  ;;  %vm787_vm6 = vmor %vm785_vm4, %vm786_vm7  ;;  %2392 = vrcp.f32 %v3243_v48  ;;  %v792_v55 = vor.u32 1.1754944e-38, %v791_v63  ;;  %v821_v11 = vand.u32 2147483648, %v3217_v37  ;;  %vm815_vm10 = vweird.f32 %v3217_v37 }
 0x210   : > { %997 = vperm.xlu1 %2296, %v899_v14   ;;  %v811_v60 = vmul.f32 %v2389_v15, %v3217_v37  ;;  %v788_v43 = vsel %vm787_vm6, %v2387_v40, %v784_v44  ;;  %vm790_vm1 = vcmp.eq.f32.partialorder %v789_v4, 8.507059e+37  ;;  %vm816_vm8 = vweird.f32 %v2389_v15 }
 0x211   : > { %v793_v21 = vsel %vm790_vm1, %v792_v55, %v788_v43  ;;  %v819_v45 = vand.u32 2147483647, %v3217_v37  ;;  %vm817_vm11 = vmor %vm815_vm10, %vm816_vm8  ;;  %2394 = vrcp.f32 %v3253_v20  ;;  %v1245_v8 = vperm.slane %v2396_v12, 7 }
 0x212   : > { %v812_v0 = vsub.f32 1.0, %v811_v60  ;;  %v794_v32 = vmul.f32 %v2804_v33, %v793_v21  ;;  %v822_v40 = vor.u32 1.1754944e-38, %v821_v11  ;;  %v1189_v54 = vperm.slane %v2397_v53, 7 }
 0x213   : > { %v2391_v57 = vpop.eup %2390  ;;  %vm820_vm3 = vcmp.eq.f32.partialorder %v819_v45, 8.507059e+37  ;;  %v836_v36 = vand.u32 2147483648, %v3237_v46  ;;  %vm830_vm13 = vweird.f32 %v3237_v46  ;;  %v834_v10 = vand.u32 2147483647, %v3237_v46 }
 0x214   : > { %952 = vperm.xlu2 %2294, %v764_v35   ;;  %v813_v22 = vmul.f32 %v2389_v15, %v812_v0  ;;  %v826_v18 = vmul.f32 %v2391_v57, %v3237_v46  ;;  %vm831_vm12 = vweird.f32 %v2391_v57  ;;  %v881_v41 = vand.u32 2147483648, %v3243_v48 }
 0x215   : > { %v2393_v2 = vpop.eup %2392  ;;  %vm832_vm2 = vmor %vm830_vm13, %vm831_vm12  ;;  %v837_v38 = vor.u32 1.1754944e-38, %v836_v36  ;;  %vm835_vm14 = vcmp.eq.f32.partialorder %v834_v10, 8.507059e+37  ;;  %vm875_vm9 = vweird.f32 %v3243_v48  ;;  %v879_v46 = vand.u32 2147483647, %v3243_v48 }
 0x216   : > { %v814_v3 = vadd.f32 %v2389_v15, %v813_v22  ;;  %v827_v13 = vsub.f32 1.0, %v826_v18  ;;  %v871_v5 = vmul.f32 %v2393_v2, %v3243_v48  ;;  %vm876_vm15 = vweird.f32 %v2393_v2 }
 0x217   : > { %2299 = vset.pattern.permute.xlu0 %v2628_v61  ;;  %v2395_v37 = vpop.eup %2394  ;;  %vm877_vm5 = vmor %vm875_vm9, %vm876_vm15  ;;  %v882_v14 = vor.u32 1.1754944e-38, %v881_v41  ;;  %vm880_vm7 = vcmp.eq.f32.partialorder %v879_v46, 8.507059e+37  ;;  %v926_v63 = vand.u32 2147483648, %v3253_v20  ;;  %vm920_vm6 = vweird.f32 %v3253_v20 }
 0x218   : > { %2298 = vset.pattern.permute.xlu1 %v2628_v61  ;;  %v818_v7 = vsel %vm817_vm11, %v2389_v15, %v814_v3  ;;  %v828_v58 = vmul.f32 %v2391_v57, %v827_v13  ;;  %v872_v59 = vsub.f32 1.0, %v871_v5  ;;  %v916_v56 = vmul.f32 %v2395_v37, %v3253_v20 }
 0x219   : > { %v823_v26 = vsel %vm820_vm3, %v822_v40, %v818_v7  ;;  %vm921_vm4 = vweird.f32 %v2395_v37  ;;  %v927_v4 = vor.u32 1.1754944e-38, %v926_v63  ;;  %v1238_v0 = vperm.slane %v2396_v12, 6 }
 0x21a   : > { %v829_v33 = vadd.f32 %v2391_v57, %v828_v58  ;;  %v824_v52 = vmul.f32 %v2769_v6, %v823_v26  ;;  %v873_v34 = vmul.f32 %v2393_v2, %v872_v59  ;;  %v917_v9 = vsub.f32 1.0, %v916_v56  ;;  %vm922_vm1 = vmor %vm920_vm6, %vm921_vm4 }
 0x21b   : > { %vm3469_vm10 = vcmask 1041409   ;;  %vm3470_vm11 = vcmask 1042434   ;;  %vm3471_vm3 = vcmask 1043459   ;;  %vm3472_vm12 = vcmask 257024  }
 0x21c   : > { %962 = vperm.xlu2 %2294, %v794_v32   ;;  %v833_v23 = vsel %vm832_vm2, %v2391_v57, %v829_v33  ;;  %v874_v28 = vadd.f32 %v2393_v2, %v873_v34  ;;  %v918_v29 = vmul.f32 %v2395_v37, %v917_v9  ;;  %vm3475_vm13 = vmmov %vm3472_vm12  ;;  %vm3478_vm2 = vcmask 1044484  }
 0x21d   : > { %v838_v62 = vsel %vm835_vm14, %v837_v38, %v833_v23  ;;  %vm3479_vm14 = vcmask 1045509   ;;  %vm3484_vm15 = vcmask 1046534   ;;  %vm3485_vm9 = vcmask 1047559   ;;  %vm3488_vm4 = vmmov %vm3470_vm11 }
 0x21e   : > { %v839_v6 = vmul.f32 %v2820_v31, %v838_v62  ;;  %v878_v30 = vsel %vm877_vm5, %v2393_v2, %v874_v28  ;;  %v919_v15 = vadd.f32 %v2395_v37, %v918_v29  ;;  %v924_v31 = vand.u32 2147483647, %v3253_v20  ;;  %vm3486_vm5 = vmmov %vm3472_vm12 }
 0x21f   : > { %1250 = vperm.xlu0 %2299, %v1245_v8   ;;  %v883_v44 = vsel %vm880_vm7, %v882_v14, %v878_v30  ;;  %vm3487_vm7 = vmmov %vm3469_vm10 }
 0x220   : > { %1194 = vperm.xlu1 %2298, %v1189_v54   ;;  %v884_v35 = vmul.f32 %v2826_v49, %v883_v44  ;;  %v923_v48 = vsel %vm922_vm1, %v2395_v37, %v919_v15  ;;  %vm925_vm8 = vcmp.eq.f32.partialorder %v924_v31, 8.507059e+37  ;;  %vm3489_vm6 = vmmov %vm3486_vm5 }
 0x221   : > { %v928_v60 = vsel %vm925_vm8, %v927_v4, %v923_v48  ;;  %vm3491_vm1 = vmmov %vm3486_vm5 }
 0x222   : > { %v929_v43 = vmul.f32 %v2829_v50, %v928_v60  ;;  %v1260_v60 = vmul.f32 %v2703_v24, %v2832_v51  ;;  %vm3493_vm8 = vmmov %vm3471_vm3 }
 0x224   : > { %972 = vperm.xlu2 %2294, %v824_v52  }
 0x22c   : > { %977 = vperm.xlu2 %2294, %v839_v6  }
 0x234   : > { %992 = vperm.xlu2 %2294, %v884_v35  }
 0x23c   : > { %1007 = vperm.xlu2 %2294, %v929_v43  }
 0x244   : > { %2297 = vset.pattern.permute.xlu2 %v2628_v61 }
 0x24c   : > { %1243 = vperm.xlu2 %2297, %v1238_v0  }
 0x24e   : > { %v933_v57 = vpop.permute.xlu2 %932 }
 0x24f   : > { %v1010_v49 = vmul.f32 %v933_v57, %v2582_v17 }
 0x251   : > { %v1026_v55 = vsel %vm420_vm0, %v1010_v49, 0.0 }
 0x252   : > { %v1027_v22 = vrot.slane %v1026_v55, 4 }
 0x254   : > { %v1028_v18 = vadd.f32 %v1027_v22, %v1026_v55 }
 0x256   : > { %v938_v21 = vpop.permute.xlu2 %937  ;;  %v1029_v3 = vrot.slane %v1028_v18, 2 }
 0x257   : > { %v1011_v20 = vmul.f32 %v938_v21, %v2592_v25 }
 0x258   : > { %v1030_v50 = vadd.f32 %v1029_v3, %v1028_v18 }
 0x259   : > { %v1033_v13 = vsel %vm420_vm0, %v1011_v20, 0.0 }
 0x25a   : > { %v1034_v2 = vrot.slane %v1033_v13, 4  ;;  %v1031_v7 = vrot.slane %v1030_v50, 1 }
 0x25c   : > { %v1035_v11 = vadd.f32 %v1034_v2, %v1033_v13  ;;  %v1032_v5 = vadd.f32 %v1031_v7, %v1030_v50  ;;  %v1307_v2 = vsel %vm3472_vm12, %v1260_v60, 0.0  ;;  %vm3498_vm12 = vmmov %vm3491_vm1 }
 0x25d   : > { %v1308_v7 = vrot.slane %v1307_v2, 4 }
 0x25e   : > { %v1036_v32 = vrot.slane %v1035_v11, 2  ;;  %v943_v61 = vpop.permute.xlu2 %942 }
 0x25f   : > { %v1012_v45 = vmul.f32 %v943_v61, %v2580_v16  ;;  %v1261_v61 = vmul.f32 %v2703_v24, %v2836_v1 }
 0x260   : > { %v1037_v58 = vadd.f32 %v1036_v32, %v1035_v11 }
 0x261   : > { %v1040_v17 = vsel %vm420_vm0, %v1012_v45, 0.0 }
 0x262   : > { %v1038_v12 = vrot.slane %v1037_v58, 1  ;;  %v1041_v8 = vrot.slane %v1040_v17, 4  ;;  %v1735_v55 = vpop.f32.mrf.mxu2 }
 0x264   : > { %v1039_v40 = vadd.f32 %v1038_v12, %v1037_v58  ;;  %v1042_v53 = vadd.f32 %v1041_v8, %v1040_v17 }
 0x265   : > { %v958_v37 = vpop.permute.xlu1 %957  ;;  %v1707_v44 = vpop.f32.mrf.mxu0 }
 0x266   : > { %v1772_v25 = vsel %vm3469_vm10, %v1039_v40, %v1032_v5  ;;  %v1043_v54 = vrot.slane %v1042_v53, 2  ;;  %v948_v26 = vpop.permute.xlu2 %947  ;;  %v1015_v10 = vmul.f32 %v958_v37, %v2609_v42  ;;  %v3297_v42 = vld [vmem:[%s3410_s4] sm:$0xff]  ;;  %v1309_v37 = vadd.f32 %v1308_v7, %v1307_v2  ;;  %v3482_v2 = vld [vmem:[#allocation16_spill] sm:$0xff]  ;;  %vm3495_vm10 = vmmov %vm3479_vm14 }
 0x267   : > { %v1013_v33 = vmul.f32 %v948_v26, %v2586_v19  ;;  %v968_v19 = vpop.permute.xlu0 %967  ;;  %v1485_v14 = vperm.slane %v3297_v42, 3 }
 0x268   : > { %v1044_v59 = vadd.f32 %v1043_v54, %v1042_v53  ;;  %v1061_v28 = vsel %vm420_vm0, %v1015_v10, 0.0  ;;  %v1017_v15 = vmul.f32 %v968_v19, %v2605_v39  ;;  %v3474_v54 = vld [vmem:[#allocation5_spill] sm:$0xff] }
 0x269   : > { %v1047_v36 = vsel %vm420_vm0, %v1013_v33, 0.0  ;;  %v1062_v46 = vrot.slane %v1061_v28, 4  ;;  %v1314_v33 = vsel %vm3475_vm13, %v1261_v61, 0.0  ;;  %vm3499_vm13 = vmmov %vm3484_vm15 }
 0x26a   : > { %v1045_v16 = vrot.slane %v1044_v59, 1  ;;  %v1048_v52 = vrot.slane %v1047_v36, 4  ;;  %v1075_v43 = vsel %vm420_vm0, %v1017_v15, 0.0  ;;  %v1737_v42 = vpop.f32.mrf.mxu2 }
 0x26b   : > { %v1063_v31 = vadd.f32 %v1062_v46, %v1061_v28  ;;  %v1721_v49 = vpop.f32.mrf.mxu1  ;;  %v1076_v20 = vrot.slane %v1075_v43, 4 }
 0x26c   : > { %v1046_v23 = vadd.f32 %v1045_v16, %v1044_v59  ;;  %v1049_v34 = vadd.f32 %v1048_v52, %v1047_v36  ;;  %v3476_v16 = vld [vmem:[#allocation8_spill] sm:$0xff] }
 0x26d   : > { %v1064_v21 = vrot.slane %v1063_v31, 2  ;;  %v1077_v17 = vadd.f32 %v1076_v20, %v1075_v43 }
 0x26e   : > { %v1773_v56 = vsel %vm3470_vm11, %v1046_v23, %v1772_v25  ;;  %v1050_v38 = vrot.slane %v1049_v34, 2  ;;  %v953_v62 = vpop.permute.xlu2 %952  ;;  %vm3496_vm11 = vmmov %vm3478_vm2 }
 0x26f   : > { %v1014_v9 = vmul.f32 %v953_v62, %v2595_v27  ;;  %v1708_v27 = vadd.f32 %v1707_v44, %v1485_v14  ;;  %v1065_v58 = vadd.f32 %v1064_v21, %v1063_v31  ;;  %v1078_v36 = vrot.slane %v1077_v17, 2  ;;  %v3481_v21 = vld [vmem:[#allocation11_spill] sm:$0xff] }
 0x270   : > { %v1051_v41 = vadd.f32 %v1050_v38, %v1049_v34  ;;  %v1315_v38 = vrot.slane %v1314_v33, 4 }
 0x271   : > { %v1054_v6 = vsel %vm420_vm0, %v1014_v9, 0.0  ;;  %v1722_v39 = vadd.f32 %v1721_v49, %v1708_v27  ;;  %v1749_v18 = vpop.f32.mrf.mxu3  ;;  %v1066_v23 = vrot.slane %v1065_v58, 1  ;;  %v1310_v9 = vrot.slane %v1309_v37, 2 }
 0x272   : > { %v1052_v30 = vrot.slane %v1051_v41, 1  ;;  %v1055_v29 = vrot.slane %v1054_v6, 4 }
 0x273   : > { %v1736_v13 = vadd.f32 %v1735_v55, %v1722_v39  ;;  %v1067_v46 = vadd.f32 %v1066_v23, %v1065_v58 }
 0x274   : > { %v1053_v63 = vadd.f32 %v1052_v30, %v1051_v41  ;;  %v1056_v35 = vadd.f32 %v1055_v29, %v1054_v6  ;;  %v1079_v41 = vadd.f32 %v1078_v36, %v1077_v17  ;;  %v3477_v29 = vld [vmem:[#allocation7_spill] sm:$0xff]  ;;  %v3483_v17 = vld [vmem:[#allocation10_spill] sm:$0xff] }
 0x275   : > { %v1750_v32 = vadd.f32 %v1749_v18, %v1736_v13 }
 0x276   : > { %v1774_v48 = vsel %vm3471_vm3, %v1053_v63, %v1773_v56  ;;  %v963_v4 = vpop.permute.xlu2 %962  ;;  %v1057_v0 = vrot.slane %v1056_v35, 2  ;;  %v1316_v63 = vadd.f32 %v1315_v38, %v1314_v33  ;;  %v1080_v49 = vrot.slane %v1079_v41, 1  ;;  %vm3497_vm3 = vmmov %vm3495_vm10 }
 0x277   : > { %v1016_v57 = vmul.f32 %v963_v4, %v2613_v47  ;;  %v3473_v47 = vld [vmem:[#allocation6_spill] sm:$0xff]  ;;  %v1754_v5 = vmax.f32 %v1750_v32, 0.0 }
 0x278   : > { %v1058_v50 = vadd.f32 %v1057_v0, %v1056_v35  ;;  %v1081_v61 = vadd.f32 %v1080_v49, %v1079_v41 }
 0x279   : > { %v1068_v22 = vsel %vm420_vm0, %v1016_v57, 0.0  ;;  %v988_v12 = vpop.permute.xlu0 %987  ;;  %1840 = vrot.lane.b32.xlu0 %v1754_v5, %s2464_s20  ;;  %v1311_v57 = vadd.f32 %v1310_v9, %v1309_v37 }
 0x27a   : > { %v1069_v3 = vrot.slane %v1068_v22, 4  ;;  %v983_v51 = vpop.permute.xlu1 %982  ;;  %v1059_v40 = vrot.slane %v1058_v50, 1  ;;  %v1021_v52 = vmul.f32 %v988_v12, %v3476_v16 }
 0x27b   : > { %v1020_v45 = vmul.f32 %v983_v51, %v3473_v47  ;;  %v1312_v32 = vrot.slane %v1311_v57, 1 }
 0x27c   : > { %v1070_v11 = vadd.f32 %v1069_v3, %v1068_v22  ;;  %v1060_v34 = vadd.f32 %v1059_v40, %v1058_v50  ;;  %v1103_v19 = vsel %vm420_vm0, %v1021_v52, 0.0  ;;  %v3480_v22 = vld [vmem:[#allocation9_spill] sm:$0xff]  ;;  %v1317_v3 = vrot.slane %v1316_v63, 2 }
 0x27d   : > { %v1096_v25 = vsel %vm420_vm0, %v1020_v45, 0.0  ;;  %v1104_v60 = vrot.slane %v1103_v19, 4  ;;  %v1268_v50 = vmul.f32 %v2703_v24, %v3482_v2 }
 0x27e   : > { %v973_v8 = vpop.permute.xlu2 %972  ;;  %v1071_v53 = vrot.slane %v1070_v11, 2  ;;  %v1097_v1 = vrot.slane %v1096_v25, 4  ;;  %v1775_v15 = vsel %vm3478_vm2, %v1060_v34, %v1774_v48  ;;  %v1318_v5 = vadd.f32 %v1317_v3, %v1316_v63  ;;  %vm3500_vm2 = vmmov %vm3499_vm13 }
 0x27f   : > { %v1018_v26 = vmul.f32 %v973_v8, %v3474_v54  ;;  %v1776_v0 = vsel %vm3479_vm14, %v1067_v46, %v1775_v15  ;;  %v1105_v51 = vadd.f32 %v1104_v60, %v1103_v19  ;;  %v1363_v54 = vsel %vm3486_vm5, %v1268_v50, 0.0  ;;  %vm3501_vm14 = vmmov %vm3485_vm9 }
 0x280   : > { %v1072_v56 = vadd.f32 %v1071_v53, %v1070_v11  ;;  %v1098_v28 = vadd.f32 %v1097_v1, %v1096_v25  ;;  %v1364_v9 = vrot.slane %v1363_v54, 4  ;;  %vm3505_vm5 = vmmov %vm3500_vm2 }
 0x281   : > { %v1082_v59 = vsel %vm420_vm0, %v1018_v26, 0.0  ;;  %v1003_v31 = vpop.permute.xlu0 %1002  ;;  %v1106_v33 = vrot.slane %v1105_v51, 2 }
 0x282   : > { %v1083_v10 = vrot.slane %v1082_v59, 4  ;;  %v1073_v30 = vrot.slane %v1072_v56, 1  ;;  %v998_v27 = vpop.permute.xlu1 %997  ;;  %v1099_v4 = vrot.slane %v1098_v28, 2  ;;  %v1024_v20 = vmul.f32 %v1003_v31, %v3481_v21 }
 0x283   : > { %v1023_v18 = vmul.f32 %v998_v27, %v3480_v22  ;;  %v3490_v27 = vld [vmem:[#allocation12_spill] sm:$0xff]  ;;  %v1365_v49 = vadd.f32 %v1364_v9, %v1363_v54 }
 0x284   : > { %v1084_v62 = vadd.f32 %v1083_v10, %v1082_v59  ;;  %v1074_v39 = vadd.f32 %v1073_v30, %v1072_v56  ;;  %v1100_v11 = vadd.f32 %v1099_v4, %v1098_v28  ;;  %v1124_v58 = vsel %vm420_vm0, %v1024_v20, 0.0 }
 0x285   : > { %v1117_v7 = vsel %vm420_vm0, %v1023_v18, 0.0  ;;  %v1125_v37 = vrot.slane %v1124_v58, 4  ;;  %v1313_v10 = vadd.f32 %v1312_v32, %v1311_v57  ;;  %v1319_v28 = vrot.slane %v1318_v5, 1 }
 0x286   : > { %v978_v6 = vpop.permute.xlu2 %977  ;;  %v1085_v35 = vrot.slane %v1084_v62, 2  ;;  %v1777_v8 = vsel %vm3484_vm15, %v1074_v39, %v1776_v0  ;;  %v1101_v26 = vrot.slane %v1100_v11, 1  ;;  %v1118_v59 = vrot.slane %v1117_v7, 4  ;;  %vm3502_vm15 = vmmov %vm3485_vm9 }
 0x287   : > { %v1019_v44 = vmul.f32 %v978_v6, %v3477_v29  ;;  %v3333_v25 = vsel %vm3485_vm9, %v1081_v61, %v1777_v8  ;;  %v1107_v6 = vadd.f32 %v1106_v33, %v1105_v51  ;;  %v1126_v30 = vadd.f32 %v1125_v37, %v1124_v58  ;;  %vm3504_vm9 = vmmov %vm3497_vm3 }
 0x288   : > { %v1086_v48 = vadd.f32 %v1085_v35, %v1084_v62  ;;  %v1102_v41 = vadd.f32 %v1101_v26, %v1100_v11  ;;  %v1119_v46 = vadd.f32 %v1118_v59, %v1117_v7  ;;  %v1320_v57 = vadd.f32 %v1319_v28, %v1318_v5  ;;  %v1723_v5 = vpop.f32.mrf.mxu1 }
 0x289   : > { %v1089_v43 = vsel %vm420_vm0, %v1019_v44, 0.0  ;;  %v1127_v22 = vrot.slane %v1126_v30, 2  ;;  %v1108_v20 = vrot.slane %v1107_v6, 1  ;;  %v1366_v51 = vrot.slane %v1365_v49, 2 }
 0x28a   : > { %v1090_v55 = vrot.slane %v1089_v43, 4  ;;  %v1087_v40 = vrot.slane %v1086_v48, 1  ;;  %v1120_v39 = vrot.slane %v1119_v46, 2 }
 0x28b   : > { %v1109_v58 = vadd.f32 %v1108_v20, %v1107_v6  ;;  %v1367_v54 = vadd.f32 %v1366_v51, %v1365_v49 }
 0x28c   : > { %v1091_v13 = vadd.f32 %v1090_v55, %v1089_v43  ;;  %v1088_v23 = vadd.f32 %v1087_v40, %v1086_v48  ;;  %v3492_v43 = vld [vmem:[#allocation13_spill] sm:$0xff]  ;;  %v1121_v61 = vadd.f32 %v1120_v39, %v1119_v46 }
 0x28d   : > { %v1390_v0 = vadd.f32 %v3492_v43, %v1313_v10  ;;  %v1391_v32 = vadd.f32 %v3492_v43, %v1320_v57 }
 0x28e   : > { %v1092_v47 = vrot.slane %v1091_v13, 2  ;;  %v993_v45 = vpop.permute.xlu2 %992 }
 0x28f   : > { %v1022_v12 = vmul.f32 %v993_v45, %v3483_v17  ;;  %v1406_v11 = vmax.f32 %v1390_v0, 0.0  ;;  %v1407_v26 = vmax.f32 %v1391_v32, 0.0 }
 0x290   : > { %v1093_v53 = vadd.f32 %v1092_v47, %v1091_v13  ;;  %v1709_v13 = vpop.f32.mrf.mxu0  ;;  %v1128_v47 = vadd.f32 %v1127_v22, %v1126_v30 }
 0x291   : > { %v1110_v1 = vsel %vm420_vm0, %v1022_v12, 0.0  ;;  %v1251_v52 = vpop.permute.xlu0 %1250  ;;  %v1710_v7 = vadd.f32 %v1709_v13, %v1485_v14 }
 0x292   : > { %v1094_v36 = vrot.slane %v1093_v53, 1  ;;  %v1111_v16 = vrot.slane %v1110_v1, 4  ;;  %v1195_v38 = vpop.permute.xlu1 %1194  ;;  %v1270_v62 = vmul.f32 %v2703_v24, %v1251_v52  ;;  %v1129_v59 = vrot.slane %v1128_v47, 1 }
 0x293   : > { %v1262_v19 = vmul.f32 %v2703_v24, %v1195_v38  ;;  %v1814_v38 = vrot.slane %v1407_v26, 2 }
 0x294   : > { %v1095_v34 = vadd.f32 %v1094_v36, %v1093_v53  ;;  %v1112_v56 = vadd.f32 %v1111_v16, %v1110_v1  ;;  %v1377_v60 = vsel %vm3491_vm1, %v1270_v62, 0.0  ;;  %v1812_v53 = vrot.slane %v1406_v11, 3 }
 0x295   : > { %v1321_v35 = vsel %vm3489_vm6, %v1262_v19, 0.0  ;;  %v1378_v48 = vrot.slane %v1377_v60, 4  ;;  %v1122_v1 = vrot.slane %v1121_v61, 1  ;;  %v1724_v36 = vadd.f32 %v1723_v5, %v1710_v7 }
 0x296   : > { %v1779_v29 = vsel %vm3487_vm7, %v1095_v34, %v1088_v23  ;;  %v1008_v44 = vpop.permute.xlu2 %1007  ;;  %v1113_v63 = vrot.slane %v1112_v56, 2  ;;  %v1322_v4 = vrot.slane %v1321_v35, 4  ;;  %v1368_v23 = vrot.slane %v1367_v54, 1  ;;  %v3494_v34 = vld [vmem:[#allocation15_spill] sm:$0xff]  ;;  %vm3506_vm7 = vmmov %vm3501_vm14 }
 0x297   : > { %v1780_v15 = vsel %vm3488_vm4, %v1102_v41, %v1779_v29  ;;  %v1025_v31 = vmul.f32 %v1008_v44, %v3490_v27  ;;  %v1379_v8 = vadd.f32 %v1378_v48, %v1377_v60  ;;  %v1123_v62 = vadd.f32 %v1122_v1, %v1121_v61 }
 0x298   : > { %v1323_v18 = vadd.f32 %v1322_v4, %v1321_v35  ;;  %v1114_v3 = vadd.f32 %v1113_v63, %v1112_v56  ;;  %v1781_v33 = vsel %vm3493_vm8, %v1109_v58, %v1780_v15  ;;  %v1813_v56 = vsel %vm3495_vm10, %v1812_v53, %v3494_v34  ;;  %v1751_v15 = vpop.f32.mrf.mxu3 }
 0x299   : > { %v1131_v55 = vsel %vm420_vm0, %v1025_v31, 0.0  ;;  %v1380_v10 = vrot.slane %v1379_v8, 2  ;;  %v1130_v28 = vadd.f32 %v1129_v59, %v1128_v47  ;;  %v1738_v19 = vadd.f32 %v1737_v42, %v1724_v36 }
 0x29a   : > { %v1132_v21 = vrot.slane %v1131_v55, 4  ;;  %v1324_v2 = vrot.slane %v1323_v18, 2  ;;  %v1115_v17 = vrot.slane %v1114_v3, 1  ;;  %v1815_v27 = vsel %vm3499_vm13, %v1814_v38, %v1813_v56 }
 0x29b   : > { %v1381_v46 = vadd.f32 %v1380_v10, %v1379_v8  ;;  %v1369_v0 = vadd.f32 %v1368_v23, %v1367_v54  ;;  %vm1848_vm4 = vcmask 523264   ;;  %vm1851_vm6 = vcmask 785408  }
 0x29c   : > { %v1133_v50 = vadd.f32 %v1132_v21, %v1131_v55  ;;  %v1325_v45 = vadd.f32 %v1324_v2, %v1323_v18  ;;  %v1116_v16 = vadd.f32 %v1115_v17, %v1114_v3 }
 0x29d   : > { %v1382_v49 = vrot.slane %v1381_v46, 1  ;;  %v1398_v22 = vadd.f32 %v3492_v43, %v1369_v0 }
 0x29e   : > { %v1134_v12 = vrot.slane %v1133_v50, 2  ;;  %v1326_v40 = vrot.slane %v1325_v45, 1  ;;  %v1782_v29 = vsel %vm3496_vm11, %v1116_v16, %v1781_v33 }
 0x29f   : > { %v1783_v63 = vsel %vm3497_vm3, %v1123_v62, %v1782_v29  ;;  %v1383_v18 = vadd.f32 %v1382_v49, %v1381_v46  ;;  %v1414_v13 = vmax.f32 %v1398_v22, 0.0 }
 0x2a0   : > { %v1327_v37 = vadd.f32 %v1326_v40, %v1325_v45  ;;  %v1135_v52 = vadd.f32 %v1134_v12, %v1133_v50  ;;  %v1784_v31 = vsel %vm3500_vm2, %v1130_v28, %v1783_v63  ;;  %v3503_v45 = vld [vmem:[#allocation14_spill] sm:$0xff] }
 0x2a1   : > { %v1400_v2 = vadd.f32 %v3492_v43, %v1383_v18  ;;  %v1826_v51 = vrot.slane %v1414_v13, 3 }
 0x2a2   : > { %v1392_v14 = vadd.f32 %v3492_v43, %v1327_v37  ;;  %v1136_v6 = vrot.slane %v1135_v52, 1 }
 0x2a3   : > { %v1416_v32 = vmax.f32 %v1400_v2, 0.0  ;;  %v1827_v7 = vsel %vm3504_vm9, %v1826_v51, %v3503_v45 }
 0x2a4   : > { %v1408_v41 = vmax.f32 %v1392_v14, 0.0  ;;  %v1137_v57 = vadd.f32 %v1136_v6, %v1135_v52 }
 0x2a5   : > { %v1830_v58 = vrot.slane %v1416_v32, 1 }
 0x2a6   : > { %v1244_v9 = vpop.permute.xlu2 %1243  ;;  %v1816_v44 = vrot.slane %v1408_v41, 1  ;;  %v1785_v20 = vsel %vm3502_vm15, %v1137_v57, %v1784_v31 }
 0x2a7   : > { %v1269_v30 = vmul.f32 %v2703_v24, %v1244_v9  ;;  %v1752_v24 = vadd.f32 %v1751_v15, %v1738_v19 }
 0x2a8   : > { %v1817_v60 = vsel %vm3501_vm14, %v1816_v44, %v1815_v27 }
 0x2a9   : > { %v1370_v35 = vsel %vm3498_vm12, %v1269_v30, 0.0  ;;  %1832 = vrot.lane.b32.xlu2 %v1817_v60, %s2465_s13  ;;  %v1755_v21 = vmax.f32 %v1752_v24, 0.0 }
 0x2aa   : > { %v1371_v4 = vrot.slane %v1370_v35, 4 }
 0x2ac   : > { %v1372_v55 = vadd.f32 %v1371_v4, %v1370_v35 }
 0x2ae   : > { %v1373_v39 = vrot.slane %v1372_v55, 2 }
 0x2b0   : > { %v1374_v3 = vadd.f32 %v1373_v39, %v1372_v55 }
 0x2b1   : > { %1842 = vrot.lane.b32.xlu2 %v1755_v21, %s2464_s20 }
 0x2b2   : > { %v1375_v48 = vrot.slane %v1374_v3, 1 }
 0x2b4   : > { %v1376_v50 = vadd.f32 %v1375_v48, %v1374_v3 }
 0x2b6   : > { %v1399_v11 = vadd.f32 %v3492_v43, %v1376_v50 }
 0x2b8   : > { %v1415_v61 = vmax.f32 %v1399_v11, 0.0 }
 0x2ba   : > { %v1828_v47 = vrot.slane %v1415_v61, 2 }
 0x2bc   : > { %v1829_v17 = vsel %vm3505_vm5, %v1828_v47, %v1827_v7 }
 0x2bd   : > { %v1831_v12 = vsel %vm3506_vm7, %v1830_v58, %v1829_v17 }
 0x2be   : > { %1834 = vrot.lane.b32.xlu1 %v1831_v12, %s2465_s13 }
 0x2eb   : > { %v1841_v8 = vpop.permute.xlu0 %1840 }
 0x303   : > { %v1833_v5 = vpop.permute.xlu2 %1832 }
 0x304   : > { %v1846_v43 = vsel %vm420_vm0, %v3333_v25, %v1833_v5 }
 0x305   : > { %v1849_v40 = vsel %vm1848_vm4, %v1846_v43, %v1841_v8 }
 0x306   : > { %1852 = vst.msk [vmem:[%s295_s16] sm:$0xff] %vm1851_vm6, %v1849_v40 }
 0x30b   : > { %v1843_v54 = vpop.permute.xlu2 %1842 }
 0x330   : > { %v1835_v53 = vpop.permute.xlu1 %1834 }
 0x331   : > { %v1847_v26 = vsel %vm420_vm0, %v1785_v20, %v1835_v53 }
 0x332   : > { %v1850_v33 = vsel %vm1848_vm4, %v1847_v26, %v1843_v54 }
 0x333   : > { %1853 = vst.msk [vmem:[%s295_s16 + $0x8] sm:$0xff] %vm1851_vm6, %v1850_v33 }
 0x334   : > { %2426 = shalt.err (!%p2423_p4)
}
 0x335   : > { %s2466_s14 = smov 128   ;;  %s2467_s15 = smov 8  }
 0x336   : > { %2247 = dma.vmem_to_hbm [thread:$0]  (%p2541_p5), %s1868_s26, 256, %s1870_s28, %s1855_s29, %s2466_s14, %s2466_s14, %s2467_s15  }
 0x337 PF: > { %p2253_p7 = scmp.ge.s32.totalorder %s2461_s24, 2  ;;  %s1884_s16 = sand.u32 1, %s2449_s21  }
 0x338   : > { %s1885_s17 = scalar_lea.sflag [#allocation3], %s1884_s16 }
 0x339   : > { %p2250_p8 = pnand %p2253_p7, %p2545_p6 }
 0x33b   : > { %p2251_p9 = pneg %p2250_p8 }
 0x33d   : > { %2444 = dma.done.wait (%p2251_p9), %s1885_s17, 256  }
 0x33e   : > { %2446 = vsyncadd (%p2251_p9), %s1885_s17, 4294967040  ;;  %p16_p10 = scmp.ge.s32.totalorder %s2528_s27, 4   ;;  %s3507_s21 = smov %s2453_s22 }
 0x33f   : > { %s3508_s22 = smov %s2457_s23  ;;  %s3509_s23 = smov %s2539_s30 }
 0x340   : > { %s3510_s24 = smov %s2528_s27  ;;  %18 = sbr.rel (!%p16_p10) target bundleno = 3 (0x3), region = 88 }
 0x345   :  { %1891 = vsyncpa [#allocation3], 1 }
 0x346   :  { %1893 = vsyncpa [#allocation3 + $0x1], 1 }

</bundles_post_ra>
